<compile_context>
chip_gen: v6e
topology: v6e:2x2x1
jax: 0.10.0
libtpu: 0.0.40
codegen_flags: <defaults>
</compile_context>

<pallas_src>
import functools
import math

import jax
import jax.numpy as jnp
import numpy as np
from jax.experimental import pallas as pl
from jax.experimental.pallas import tpu as pltpu

# ----------------------------- config (small shapes) -----------------------------
BATCH = 2
EMB_DIM = 32          # embedding_dim
HIDDEN = 16           # hidden_dim (BERT hidden size)
LSTM_UNITS = 8        # lstm_units
SEQ_LEN = 4           # sequence_length
NUM_HEADS = 2
NUM_LAYERS = 2
INTER = 4 * HIDDEN    # BERT FFN intermediate size
LN_EPS = 1e-12


# ----------------------------- shared math helpers -----------------------------
def _layer_norm(x, g, b, eps=LN_EPS):
    mu = jnp.mean(x, axis=-1, keepdims=True)
    var = jnp.mean((x - mu) ** 2, axis=-1, keepdims=True)
    return (x - mu) * jax.lax.rsqrt(var + eps) * g + b


def _gelu(x):
    c = math.sqrt(2.0 / math.pi)
    return 0.5 * x * (1.0 + jnp.tanh(c * (x + 0.044715 * x * x * x)))


# ----------------------------- the single fused Pallas kernel -----------------------------
def _fused_kernel(offs, batch, seq, hidden, units, heads, num_layers, emb_dim,
                  xbd_ref, slab_ref, o_ref):
    hd = hidden // heads
    scale = 1.0 / math.sqrt(hd)

    def L(name):
        r, nr, nc = offs[name]             # static, 8-sublane-aligned slab offsets
        return slab_ref[r:r + nr, 0:nc]

    # ---- embedding adapter: one block-diagonal K=128 matmul, time-major rows (t*B+b) ----
    h = jnp.dot(xbd_ref[...], L("w_bd"), preferred_element_type=jnp.float32)
    # adapter bias + positional + token-type embeddings pre-folded into one additive slab
    h = _layer_norm(h + L("emb_add"), L("emb_g"), L("emb_b"))

    mask_add = L("att_mask")               # (B*S, B*S) additive mask, 0 / -1e30

    # ---- BERT encoder layers ----
    for li in range(num_layers):
        pfx = "l%d_" % li
        # fused projection: [ Q | K | V@Wo (head 0) | V@Wo (head 1) ]
        proj = jnp.dot(h, L(pfx + "w_att"),
                       preferred_element_type=jnp.float32) + L(pfx + "b_att")
        attn = L(pfx + "bo")               # (1, H), broadcasts on first accumulate
        for hh in range(heads):            # static tiny head loop
            q_h = proj[:, hh * hd:(hh + 1) * hd]
            k_h = proj[:, hidden + hh * hd:hidden + (hh + 1) * hd]
            vo_h = proj[:, 2 * hidden + hh * hidden:2 * hidden + (hh + 1) * hidden]
            s = jax.lax.dot_general(q_h, k_h, (((1,), (1,)), ((), ())),
                                    preferred_element_type=jnp.float32) * scale + mask_add
            # LayerNorm-bounded logits -> max-subtraction dropped; masked entries exp to 0.
            p = jnp.exp(s)
            p = p * pl.reciprocal(jnp.sum(p, axis=-1, keepdims=True), approx=True)
            attn = attn + jnp.dot(p, vo_h, preferred_element_type=jnp.float32)
        x1 = _layer_norm(h + attn, L(pfx + "g1"), L(pfx + "b1"))
        hdn = _gelu(jnp.dot(x1, L(pfx + "wi"),
                            preferred_element_type=jnp.float32) + L(pfx + "bi"))
        ffn = jnp.dot(hdn, L(pfx + "wo2"),
                      preferred_element_type=jnp.float32) + L(pfx + "bo2")
        h = _layer_norm(x1 + ffn, L(pfx + "g2"), L(pfx + "b2"))

    # ---- LSTM decoder: input projection hoisted; time-major -> contiguous per-step rows ----
    gates_x = jnp.dot(h, L("wih"), preferred_element_type=jnp.float32) + L("lb")  # (B*S, 4U)
    whh = L("whh")                          # (U, 4U)
    owt = L("ow")                           # (S*U, EMB), output weight pre-transposed
    hs = jnp.zeros((batch, units), jnp.float32)
    cs = jnp.zeros((batch, units), jnp.float32)
    acc = jnp.zeros((batch, emb_dim), jnp.float32)
    for t in range(seq):                    # static unrolled recurrence
        gx_t = gates_x[t * batch:(t + 1) * batch, :]           # contiguous sublane slice
        # TODO(synk): the tiny (B,U)x(U,4U) recurrence stays on the MXU; a VPU unroll would
        #             trade v5e/v6e MRF-pop latency for 8 lane-broadcasts per step.
        gts = gx_t + jnp.dot(hs, whh, preferred_element_type=jnp.float32)
        i = jax.nn.sigmoid(gts[:, 0 * units:1 * units])
        f = jax.nn.sigmoid(gts[:, 1 * units:2 * units])
        g = jnp.tanh(gts[:, 2 * units:3 * units])
        o = jax.nn.sigmoid(gts[:, 3 * units:4 * units])
        cs = f * cs + i * g
        hs = o * jnp.tanh(cs)
        # flatten + output_layer folded into per-step accumulation (no lane concat epilogue)
        acc = acc + jnp.dot(hs, owt[t * units:(t + 1) * units, :],
                            preferred_element_type=jnp.float32)
    o_ref[...] = acc + L("ob")


# ----------------------------- host-side parameter packing -----------------------------
def _pack_params(p, batch):
    """Pack all weights into one (R,128) f32 slab; every tensor starts 8-sublane aligned."""
    offs, pieces = {}, []
    next_row = 0

    def add(name, arr):
        nonlocal next_row
        a = np.asarray(arr, np.float32)
        if a.ndim == 1:
            a = a.reshape(1, -1)
        nrows, ncols = a.shape
        offs[name] = (next_row, nrows, ncols)
        pieces.append((next_row, a))
        next_row += ((nrows + 7) // 8) * 8

    hd = HIDDEN // NUM_HEADS

    # block-diagonal adapter weight: rows t*EMB:(t+1)*EMB = adapter_w.T[:, t*H:(t+1)*H]
    awT = np.asarray(p["adapter_w"], np.float32).T                       # (EMB, S*H)
    w_bd = np.concatenate([awT[:, t * HIDDEN:(t + 1) * HIDDEN] for t in range(SEQ_LEN)],
                          axis=0)                                        # (S*EMB, H)
    add("w_bd", w_bd)

    # adapter bias + positional + token-type, pre-tiled TIME-major (row = t*B+b)
    ab = np.asarray(p["adapter_b"], np.float32).reshape(SEQ_LEN, HIDDEN)
    pos = np.asarray(p["pos_emb"], np.float32)
    typ = np.asarray(p["type_emb"], np.float32)
    add("emb_add", np.repeat(ab + pos + typ[None, :], batch, axis=0))    # (B*S, H)
    add("emb_g", p["emb_ln_g"])
    add("emb_b", p["emb_ln_b"])

    # additive attention mask (time-major): same batch iff row%B == col%B
    r = np.arange(batch * SEQ_LEN)
    same = (r[:, None] % batch) == (r[None, :] % batch)
    add("att_mask", np.where(same, 0.0, -1e30).astype(np.float32))

    for li, Lp in enumerate(p["layers"]):
        WqT = np.asarray(Lp["wq"], np.float32).T
        WkT = np.asarray(Lp["wk"], np.float32).T
        WvT = np.asarray(Lp["wv"], np.float32).T
        WoT = np.asarray(Lp["wo"], np.float32).T
        bv = np.asarray(Lp["bv"], np.float32)
        wvo, bvo = [], []
        for hh in range(NUM_HEADS):          # fuse V and output projection per head
            sl = slice(hh * hd, (hh + 1) * hd)
            wvo.append(WvT[:, sl] @ WoT[sl, :])                          # (H, H)
            bvo.append(bv[sl] @ WoT[sl, :])                              # (H,)
        add(f"l{li}_w_att", np.concatenate([WqT, WkT] + wvo, axis=1))    # (H, 4H)
        add(f"l{li}_b_att",
            np.concatenate([np.asarray(Lp["bq"], np.float32),
                            np.asarray(Lp["bk"], np.float32)] + bvo))    # (4H,)
        add(f"l{li}_bo", Lp["bo"])
        add(f"l{li}_g1", Lp["ln1_g"])
        add(f"l{li}_b1", Lp["ln1_b"])
        add(f"l{li}_wi", np.asarray(Lp["wi"], np.float32).T)             # (H, 4H)
        add(f"l{li}_bi", Lp["bi"])
        add(f"l{li}_wo2", np.asarray(Lp["wo2"], np.float32).T)           # (4H, H)
        add(f"l{li}_bo2", Lp["bo2"])
        add(f"l{li}_g2", Lp["ln2_g"])
        add(f"l{li}_b2", Lp["ln2_b"])

    add("wih", np.asarray(p["lstm_w_ih"], np.float32).T)                 # (H, 4U)
    add("whh", np.asarray(p["lstm_w_hh"], np.float32).T)                 # (U, 4U)
    add("lb", np.asarray(p["lstm_b_ih"], np.float32)
              + np.asarray(p["lstm_b_hh"], np.float32))                  # (4U,)
    add("ow", np.asarray(p["out_w"], np.float32).T)                      # (S*U, EMB)
    add("ob", p["out_b"])

    slab = np.zeros((max(8, next_row), 128), np.float32)
    for r0, a in pieces:
        slab[r0:r0 + a.shape[0], :a.shape[1]] = a
    return jnp.asarray(slab), offs


# ----------------------------- wrapper: one pallas_call -----------------------------
def bert_autoencoder_forward(x, p):
    B = x.shape[0]
    slab, offs = _pack_params(p, B)          # params are concrete under jit (closure)

    # block-diagonal, time-major adapter input: row t*B+b carries x[b] in lane block t
    rows_t = np.arange(SEQ_LEN * B) // B
    cols_t = np.arange(SEQ_LEN * EMB_DIM) // EMB_DIM
    bd_mask = jnp.asarray((rows_t[:, None] == cols_t[None, :]).astype(np.float32))
    x_bd = jnp.tile(x, (SEQ_LEN, SEQ_LEN)) * bd_mask                     # (B*S, S*EMB)=(8,128)

    kernel = functools.partial(_fused_kernel, offs, B, SEQ_LEN, HIDDEN, LSTM_UNITS,
                               NUM_HEADS, NUM_LAYERS, EMB_DIM)
    # Single invocation, no grid: whole model (~300 KB) lives in VMEM; 2 input DMAs total.
    # TODO(synk): at production batch sizes add a batch grid with
    #             dimension_semantics=("parallel",) so both v7x TensorCores are used.
    return pl.pallas_call(
        kernel,
        out_shape=jax.ShapeDtypeStruct((B, EMB_DIM), jnp.float32),
        compiler_params=pltpu.CompilerParams(vmem_limit_bytes=32 * 1024 * 1024),  # cap only
    )(x_bd, slab)


# ----------------------------- pure-JAX reference -----------------------------
def _ref_bert_layer(x, L):
    B, S, H = x.shape
    hd = H // NUM_HEADS
    q = x @ L["wq"].T + L["bq"]
    k = x @ L["wk"].T + L["bk"]
    v = x @ L["wv"].T + L["bv"]

    def split(t):
        return t.reshape(B, S, NUM_HEADS, hd).transpose(0, 2, 1, 3)

    qh, kh, vh = split(q), split(k), split(v)
    s = jnp.einsum("bhqd,bhkd->bhqk", qh, kh) / math.sqrt(hd)
    pr = jax.nn.softmax(s, axis=-1)
    ctx = jnp.einsum("bhqk,bhkd->bhqd", pr, vh).transpose(0, 2, 1, 3).reshape(B, S, H)
    attn = ctx @ L["wo"].T + L["bo"]
    x1 = _layer_norm(x + attn, L["ln1_g"], L["ln1_b"])
    hdn = _gelu(x1 @ L["wi"].T + L["bi"])
    ffn = hdn @ L["wo2"].T + L["bo2"]
    return _layer_norm(x1 + ffn, L["ln2_g"], L["ln2_b"])


def reference_forward(x, p):
    B = x.shape[0]
    h = (x @ p["adapter_w"].T + p["adapter_b"]).reshape(B, SEQ_LEN, HIDDEN)
    h = h + p["pos_emb"][None] + p["type_emb"][None, None]
    h = _layer_norm(h, p["emb_ln_g"], p["emb_ln_b"])
    for L in p["layers"]:
        h = _ref_bert_layer(h, L)
    hs = jnp.zeros((B, LSTM_UNITS), jnp.float32)
    cs = jnp.zeros((B, LSTM_UNITS), jnp.float32)
    outs = []
    for t in range(SEQ_LEN):
        gates = (h[:, t, :] @ p["lstm_w_ih"].T + p["lstm_b_ih"]
                 + hs @ p["lstm_w_hh"].T + p["lstm_b_hh"])
        i = jax.nn.sigmoid(gates[:, 0 * LSTM_UNITS:1 * LSTM_UNITS])
        f = jax.nn.sigmoid(gates[:, 1 * LSTM_UNITS:2 * LSTM_UNITS])
        g = jnp.tanh(gates[:, 2 * LSTM_UNITS:3 * LSTM_UNITS])
        o = jax.nn.sigmoid(gates[:, 3 * LSTM_UNITS:4 * LSTM_UNITS])
        cs = f * cs + i * g
        hs = o * jnp.tanh(cs)
        outs.append(hs)
    d = jnp.stack(outs, axis=1).reshape(B, -1)
    return d @ p["out_w"].T + p["out_b"]


# ----------------------------- deterministic init -----------------------------
def init_params(key):
    keys = iter(jax.random.split(key, 256))

    def nrm(shape, scale=0.02):
        return (scale * jax.random.normal(next(keys), shape)).astype(jnp.float32)

    def ln_pair(n):
        return (1.0 + nrm((n,), 0.01), nrm((n,), 0.01))

    layers = []
    for _ in range(NUM_LAYERS):
        g1, b1 = ln_pair(HIDDEN)
        g2, b2 = ln_pair(HIDDEN)
        layers.append(dict(
            wq=nrm((HIDDEN, HIDDEN)), bq=nrm((HIDDEN,)),
            wk=nrm((HIDDEN, HIDDEN)), bk=nrm((HIDDEN,)),
            wv=nrm((HIDDEN, HIDDEN)), bv=nrm((HIDDEN,)),
            wo=nrm((HIDDEN, HIDDEN)), bo=nrm((HIDDEN,)),
            ln1_g=g1, ln1_b=b1,
            wi=nrm((INTER, HIDDEN)), bi=nrm((INTER,)),
            wo2=nrm((HIDDEN, INTER)), bo2=nrm((HIDDEN,)),
            ln2_g=g2, ln2_b=b2,
        ))

    emb_g, emb_b = ln_pair(HIDDEN)
    return dict(
        adapter_w=nrm((HIDDEN * SEQ_LEN, EMB_DIM)), adapter_b=nrm((HIDDEN * SEQ_LEN,)),
        pos_emb=nrm((SEQ_LEN, HIDDEN)), type_emb=nrm((HIDDEN,)),
        emb_ln_g=emb_g, emb_ln_b=emb_b,
        layers=layers,
        lstm_w_ih=nrm((4 * LSTM_UNITS, HIDDEN)),
        lstm_w_hh=nrm((4 * LSTM_UNITS, LSTM_UNITS)),
        lstm_b_ih=nrm((4 * LSTM_UNITS,)), lstm_b_hh=nrm((4 * LSTM_UNITS,)),
        out_w=nrm((EMB_DIM, LSTM_UNITS * SEQ_LEN)), out_b=nrm((EMB_DIM,)),
    )


# ----------------------------- main -----------------------------
if __name__ == "__main__":
    root = jax.random.PRNGKey(0)
    k_params, k_x = jax.random.split(root)
    params = init_params(k_params)
    x = jax.random.normal(k_x, (BATCH, EMB_DIM), jnp.float32)

    fwd = jax.jit(lambda inp: bert_autoencoder_forward(inp, params))
    out = jax.block_until_ready(fwd(x))

    ref = reference_forward(x, params)
    assert out.shape == (BATCH, EMB_DIM)
    np.testing.assert_allclose(np.asarray(out), np.asarray(ref), atol=2e-3, rtol=2e-3)

    print("KERNEL_OK")
</pallas_src>

<mosaic_0001>
module attributes {stable_mosaic.version = 11 : i64} {
  func.func @_fused_kernel(%arg0: memref<8x128xf32, #tpu.memory_space<vmem>>, %arg1: memref<552x128xf32, #tpu.memory_space<vmem>>, %arg2: memref<2x32xf32, #tpu.memory_space<vmem>>) attributes {dimension_semantics = [], scalar_prefetch = 0 : i64, scratch_operands = 0 : i64, tpu.core_type = #tpu.core_type<tc>} {
    %c0 = arith.constant 0 : index
    %c0_0 = arith.constant 0 : index
    %0 = vector.load %arg0[%c0, %c0_0] : memref<8x128xf32, #tpu.memory_space<vmem>>, vector<8x128xf32>
    %c0_1 = arith.constant 0 : index
    %c0_2 = arith.constant 0 : index
    %1 = vector.load %arg1[%c0_1, %c0_2] : memref<552x128xf32, #tpu.memory_space<vmem>>, vector<128x16xf32>
    %cst = arith.constant dense<0.000000e+00> : vector<8x16xf32>
    %2 = tpu.matmul %0, %1, %cst {dimension_numbers = #tpu.dot_dimension_numbers<[1], [0], [0], [1], [0, 0, 1, 1], [], []>} : vector<8x128xf32>, vector<128x16xf32>, vector<8x16xf32> -> vector<8x16xf32>
    %c128 = arith.constant 128 : index
    %c0_3 = arith.constant 0 : index
    %3 = vector.load %arg1[%c128, %c0_3] : memref<552x128xf32, #tpu.memory_space<vmem>>, vector<8x16xf32>
    %4 = arith.addf %2, %3 : vector<8x16xf32>
    %c136 = arith.constant 136 : index
    %c0_4 = arith.constant 0 : index
    %5 = vector.load %arg1[%c136, %c0_4] : memref<552x128xf32, #tpu.memory_space<vmem>>, vector<1x16xf32>
    %c144 = arith.constant 144 : index
    %c0_5 = arith.constant 0 : index
    %6 = vector.load %arg1[%c144, %c0_5] : memref<552x128xf32, #tpu.memory_space<vmem>>, vector<1x16xf32>
    %cst_6 = arith.constant dense<0.000000e+00> : vector<8xf32>
    %7 = vector.multi_reduction <add>, %4, %cst_6 [1] : vector<8x16xf32> to vector<8xf32>
    %8 = vector.shape_cast %7 : vector<8xf32> to vector<8x1xf32>
    %cst_7 = arith.constant 1.600000e+01 : f32
    %9 = vector.broadcast %cst_7 : f32 to vector<8x1xf32>
    %10 = arith.divf %8, %9 : vector<8x1xf32>
    %11 = vector.broadcast %10 : vector<8x1xf32> to vector<8x16xf32>
    %12 = arith.subf %4, %11 : vector<8x16xf32>
    %13 = arith.mulf %12, %12 : vector<8x16xf32>
    %cst_8 = arith.constant dense<0.000000e+00> : vector<8xf32>
    %14 = vector.multi_reduction <add>, %13, %cst_8 [1] : vector<8x16xf32> to vector<8xf32>
    %15 = vector.shape_cast %14 : vector<8xf32> to vector<8x1xf32>
    %cst_9 = arith.constant 1.600000e+01 : f32
    %16 = vector.broadcast %cst_9 : f32 to vector<8x1xf32>
    %17 = arith.divf %15, %16 : vector<8x1xf32>
    %18 = vector.broadcast %10 : vector<8x1xf32> to vector<8x16xf32>
    %19 = arith.subf %4, %18 : vector<8x16xf32>
    %cst_10 = arith.constant 9.99999996E-13 : f32
    %20 = vector.broadcast %cst_10 : f32 to vector<8x1xf32>
    %21 = arith.addf %17, %20 : vector<8x1xf32>
    %22 = math.rsqrt %21 : vector<8x1xf32>
    %23 = vector.broadcast %22 : vector<8x1xf32> to vector<8x16xf32>
    %24 = arith.mulf %19, %23 : vector<8x16xf32>
    %25 = vector.broadcast %5 : vector<1x16xf32> to vector<8x16xf32>
    %26 = arith.mulf %24, %25 : vector<8x16xf32>
    %27 = vector.broadcast %6 : vector<1x16xf32> to vector<8x16xf32>
    %28 = arith.addf %26, %27 : vector<8x16xf32>
    %c152 = arith.constant 152 : index
    %c0_11 = arith.constant 0 : index
    %29 = vector.load %arg1[%c152, %c0_11] : memref<552x128xf32, #tpu.memory_space<vmem>>, vector<8x8xf32>
    %c160 = arith.constant 160 : index
    %c0_12 = arith.constant 0 : index
    %30 = vector.load %arg1[%c160, %c0_12] : memref<552x128xf32, #tpu.memory_space<vmem>>, vector<16x64xf32>
    %cst_13 = arith.constant dense<0.000000e+00> : vector<8x64xf32>
    %31 = tpu.matmul %28, %30, %cst_13 {dimension_numbers = #tpu.dot_dimension_numbers<[1], [0], [0], [1], [0, 0, 1, 1], [], []>} : vector<8x16xf32>, vector<16x64xf32>, vector<8x64xf32> -> vector<8x64xf32>
    %c176 = arith.constant 176 : index
    %c0_14 = arith.constant 0 : index
    %32 = vector.load %arg1[%c176, %c0_14] : memref<552x128xf32, #tpu.memory_space<vmem>>, vector<1x64xf32>
    %33 = vector.broadcast %32 : vector<1x64xf32> to vector<8x64xf32>
    %34 = arith.addf %31, %33 : vector<8x64xf32>
    %c184 = arith.constant 184 : index
    %c0_15 = arith.constant 0 : index
    %35 = vector.load %arg1[%c184, %c0_15] : memref<552x128xf32, #tpu.memory_space<vmem>>, vector<1x16xf32>
    %36 = vector.extract_strided_slice %34 {offsets = [0, 0], sizes = [8, 8], strides = [1, 1]} : vector<8x64xf32> to vector<8x8xf32>
    %37 = vector.extract_strided_slice %34 {offsets = [0, 16], sizes = [8, 8], strides = [1, 1]} : vector<8x64xf32> to vector<8x8xf32>
    %38 = vector.extract_strided_slice %34 {offsets = [0, 32], sizes = [8, 16], strides = [1, 1]} : vector<8x64xf32> to vector<8x16xf32>
    %cst_16 = arith.constant dense<0.000000e+00> : vector<8x8xf32>
    %39 = tpu.matmul %36, %37, %cst_16 {dimension_numbers = #tpu.dot_dimension_numbers<[1], [1], [0], [0], [0, 0, 1, 0], [], []>} : vector<8x8xf32>, vector<8x8xf32>, vector<8x8xf32> -> vector<8x8xf32>
    %cst_17 = arith.constant 0.353553385 : f32
    %40 = vector.broadcast %cst_17 : f32 to vector<8x8xf32>
    %41 = arith.mulf %39, %40 : vector<8x8xf32>
    %42 = arith.addf %41, %29 : vector<8x8xf32>
    %43 = math.exp %42 : vector<8x8xf32>
    %cst_18 = arith.constant dense<0.000000e+00> : vector<8xf32>
    %44 = vector.multi_reduction <add>, %43, %cst_18 [1] : vector<8x8xf32> to vector<8xf32>
    %45 = vector.shape_cast %44 : vector<8xf32> to vector<8x1xf32>
    %46 = tpu.reciprocal %45 {approx = true} : vector<8x1xf32> -> vector<8x1xf32>
    %47 = vector.broadcast %46 : vector<8x1xf32> to vector<8x8xf32>
    %48 = arith.mulf %43, %47 : vector<8x8xf32>
    %cst_19 = arith.constant dense<0.000000e+00> : vector<8x16xf32>
    %49 = tpu.matmul %48, %38, %cst_19 {dimension_numbers = #tpu.dot_dimension_numbers<[1], [0], [0], [1], [0, 0, 1, 1], [], []>} : vector<8x8xf32>, vector<8x16xf32>, vector<8x16xf32> -> vector<8x16xf32>
    %50 = vector.broadcast %35 : vector<1x16xf32> to vector<8x16xf32>
    %51 = arith.addf %50, %49 : vector<8x16xf32>
    %52 = vector.extract_strided_slice %34 {offsets = [0, 8], sizes = [8, 8], strides = [1, 1]} : vector<8x64xf32> to vector<8x8xf32>
    %53 = vector.extract_strided_slice %34 {offsets = [0, 24], sizes = [8, 8], strides = [1, 1]} : vector<8x64xf32> to vector<8x8xf32>
    %54 = vector.extract_strided_slice %34 {offsets = [0, 48], sizes = [8, 16], strides = [1, 1]} : vector<8x64xf32> to vector<8x16xf32>
    %cst_20 = arith.constant dense<0.000000e+00> : vector<8x8xf32>
    %55 = tpu.matmul %52, %53, %cst_20 {dimension_numbers = #tpu.dot_dimension_numbers<[1], [1], [0], [0], [0, 0, 1, 0], [], []>} : vector<8x8xf32>, vector<8x8xf32>, vector<8x8xf32> -> vector<8x8xf32>
    %cst_21 = arith.constant 0.353553385 : f32
    %56 = vector.broadcast %cst_21 : f32 to vector<8x8xf32>
    %57 = arith.mulf %55, %56 : vector<8x8xf32>
    %58 = arith.addf %57, %29 : vector<8x8xf32>
    %59 = math.exp %58 : vector<8x8xf32>
    %cst_22 = arith.constant dense<0.000000e+00> : vector<8xf32>
    %60 = vector.multi_reduction <add>, %59, %cst_22 [1] : vector<8x8xf32> to vector<8xf32>
    %61 = vector.shape_cast %60 : vector<8xf32> to vector<8x1xf32>
    %62 = tpu.reciprocal %61 {approx = true} : vector<8x1xf32> -> vector<8x1xf32>
    %63 = vector.broadcast %62 : vector<8x1xf32> to vector<8x8xf32>
    %64 = arith.mulf %59, %63 : vector<8x8xf32>
    %cst_23 = arith.constant dense<0.000000e+00> : vector<8x16xf32>
    %65 = tpu.matmul %64, %54, %cst_23 {dimension_numbers = #tpu.dot_dimension_numbers<[1], [0], [0], [1], [0, 0, 1, 1], [], []>} : vector<8x8xf32>, vector<8x16xf32>, vector<8x16xf32> -> vector<8x16xf32>
    %66 = arith.addf %51, %65 : vector<8x16xf32>
    %67 = arith.addf %28, %66 : vector<8x16xf32>
    %c192 = arith.constant 192 : index
    %c0_24 = arith.constant 0 : index
    %68 = vector.load %arg1[%c192, %c0_24] : memref<552x128xf32, #tpu.memory_space<vmem>>, vector<1x16xf32>
    %c200 = arith.constant 200 : index
    %c0_25 = arith.constant 0 : index
    %69 = vector.load %arg1[%c200, %c0_25] : memref<552x128xf32, #tpu.memory_space<vmem>>, vector<1x16xf32>
    %cst_26 = arith.constant dense<0.000000e+00> : vector<8xf32>
    %70 = vector.multi_reduction <add>, %67, %cst_26 [1] : vector<8x16xf32> to vector<8xf32>
    %71 = vector.shape_cast %70 : vector<8xf32> to vector<8x1xf32>
    %cst_27 = arith.constant 1.600000e+01 : f32
    %72 = vector.broadcast %cst_27 : f32 to vector<8x1xf32>
    %73 = arith.divf %71, %72 : vector<8x1xf32>
    %74 = vector.broadcast %73 : vector<8x1xf32> to vector<8x16xf32>
    %75 = arith.subf %67, %74 : vector<8x16xf32>
    %76 = arith.mulf %75, %75 : vector<8x16xf32>
    %cst_28 = arith.constant dense<0.000000e+00> : vector<8xf32>
    %77 = vector.multi_reduction <add>, %76, %cst_28 [1] : vector<8x16xf32> to vector<8xf32>
    %78 = vector.shape_cast %77 : vector<8xf32> to vector<8x1xf32>
    %cst_29 = arith.constant 1.600000e+01 : f32
    %79 = vector.broadcast %cst_29 : f32 to vector<8x1xf32>
    %80 = arith.divf %78, %79 : vector<8x1xf32>
    %81 = vector.broadcast %73 : vector<8x1xf32> to vector<8x16xf32>
    %82 = arith.subf %67, %81 : vector<8x16xf32>
    %cst_30 = arith.constant 9.99999996E-13 : f32
    %83 = vector.broadcast %cst_30 : f32 to vector<8x1xf32>
    %84 = arith.addf %80, %83 : vector<8x1xf32>
    %85 = math.rsqrt %84 : vector<8x1xf32>
    %86 = vector.broadcast %85 : vector<8x1xf32> to vector<8x16xf32>
    %87 = arith.mulf %82, %86 : vector<8x16xf32>
    %88 = vector.broadcast %68 : vector<1x16xf32> to vector<8x16xf32>
    %89 = arith.mulf %87, %88 : vector<8x16xf32>
    %90 = vector.broadcast %69 : vector<1x16xf32> to vector<8x16xf32>
    %91 = arith.addf %89, %90 : vector<8x16xf32>
    %c208 = arith.constant 208 : index
    %c0_31 = arith.constant 0 : index
    %92 = vector.load %arg1[%c208, %c0_31] : memref<552x128xf32, #tpu.memory_space<vmem>>, vector<16x64xf32>
    %cst_32 = arith.constant dense<0.000000e+00> : vector<8x64xf32>
    %93 = tpu.matmul %91, %92, %cst_32 {dimension_numbers = #tpu.dot_dimension_numbers<[1], [0], [0], [1], [0, 0, 1, 1], [], []>} : vector<8x16xf32>, vector<16x64xf32>, vector<8x64xf32> -> vector<8x64xf32>
    %c224 = arith.constant 224 : index
    %c0_33 = arith.constant 0 : index
    %94 = vector.load %arg1[%c224, %c0_33] : memref<552x128xf32, #tpu.memory_space<vmem>>, vector<1x64xf32>
    %95 = vector.broadcast %94 : vector<1x64xf32> to vector<8x64xf32>
    %96 = arith.addf %93, %95 : vector<8x64xf32>
    %cst_34 = arith.constant 5.000000e-01 : f32
    %97 = vector.broadcast %cst_34 : f32 to vector<8x64xf32>
    %98 = arith.mulf %97, %96 : vector<8x64xf32>
    %cst_35 = arith.constant 4.471500e-02 : f32
    %99 = vector.broadcast %cst_35 : f32 to vector<8x64xf32>
    %100 = arith.mulf %99, %96 : vector<8x64xf32>
    %101 = arith.mulf %100, %96 : vector<8x64xf32>
    %102 = arith.mulf %101, %96 : vector<8x64xf32>
    %103 = arith.addf %96, %102 : vector<8x64xf32>
    %cst_36 = arith.constant 0.797884583 : f32
    %104 = vector.broadcast %cst_36 : f32 to vector<8x64xf32>
    %105 = arith.mulf %104, %103 : vector<8x64xf32>
    %106 = math.tanh %105 : vector<8x64xf32>
    %cst_37 = arith.constant 1.000000e+00 : f32
    %107 = vector.broadcast %cst_37 : f32 to vector<8x64xf32>
    %108 = arith.addf %107, %106 : vector<8x64xf32>
    %109 = arith.mulf %98, %108 : vector<8x64xf32>
    %c232 = arith.constant 232 : index
    %c0_38 = arith.constant 0 : index
    %110 = vector.load %arg1[%c232, %c0_38] : memref<552x128xf32, #tpu.memory_space<vmem>>, vector<64x16xf32>
    %cst_39 = arith.constant dense<0.000000e+00> : vector<8x16xf32>
    %111 = tpu.matmul %109, %110, %cst_39 {dimension_numbers = #tpu.dot_dimension_numbers<[1], [0], [0], [1], [0, 0, 1, 1], [], []>} : vector<8x64xf32>, vector<64x16xf32>, vector<8x16xf32> -> vector<8x16xf32>
    %c296 = arith.constant 296 : index
    %c0_40 = arith.constant 0 : index
    %112 = vector.load %arg1[%c296, %c0_40] : memref<552x128xf32, #tpu.memory_space<vmem>>, vector<1x16xf32>
    %113 = vector.broadcast %112 : vector<1x16xf32> to vector<8x16xf32>
    %114 = arith.addf %111, %113 : vector<8x16xf32>
    %115 = arith.addf %91, %114 : vector<8x16xf32>
    %c304 = arith.constant 304 : index
    %c0_41 = arith.constant 0 : index
    %116 = vector.load %arg1[%c304, %c0_41] : memref<552x128xf32, #tpu.memory_space<vmem>>, vector<1x16xf32>
    %c312 = arith.constant 312 : index
    %c0_42 = arith.constant 0 : index
    %117 = vector.load %arg1[%c312, %c0_42] : memref<552x128xf32, #tpu.memory_space<vmem>>, vector<1x16xf32>
    %cst_43 = arith.constant dense<0.000000e+00> : vector<8xf32>
    %118 = vector.multi_reduction <add>, %115, %cst_43 [1] : vector<8x16xf32> to vector<8xf32>
    %119 = vector.shape_cast %118 : vector<8xf32> to vector<8x1xf32>
    %cst_44 = arith.constant 1.600000e+01 : f32
    %120 = vector.broadcast %cst_44 : f32 to vector<8x1xf32>
    %121 = arith.divf %119, %120 : vector<8x1xf32>
    %122 = vector.broadcast %121 : vector<8x1xf32> to vector<8x16xf32>
    %123 = arith.subf %115, %122 : vector<8x16xf32>
    %124 = arith.mulf %123, %123 : vector<8x16xf32>
    %cst_45 = arith.constant dense<0.000000e+00> : vector<8xf32>
    %125 = vector.multi_reduction <add>, %124, %cst_45 [1] : vector<8x16xf32> to vector<8xf32>
    %126 = vector.shape_cast %125 : vector<8xf32> to vector<8x1xf32>
    %cst_46 = arith.constant 1.600000e+01 : f32
    %127 = vector.broadcast %cst_46 : f32 to vector<8x1xf32>
    %128 = arith.divf %126, %127 : vector<8x1xf32>
    %129 = vector.broadcast %121 : vector<8x1xf32> to vector<8x16xf32>
    %130 = arith.subf %115, %129 : vector<8x16xf32>
    %cst_47 = arith.constant 9.99999996E-13 : f32
    %131 = vector.broadcast %cst_47 : f32 to vector<8x1xf32>
    %132 = arith.addf %128, %131 : vector<8x1xf32>
    %133 = math.rsqrt %132 : vector<8x1xf32>
    %134 = vector.broadcast %133 : vector<8x1xf32> to vector<8x16xf32>
    %135 = arith.mulf %130, %134 : vector<8x16xf32>
    %136 = vector.broadcast %116 : vector<1x16xf32> to vector<8x16xf32>
    %137 = arith.mulf %135, %136 : vector<8x16xf32>
    %138 = vector.broadcast %117 : vector<1x16xf32> to vector<8x16xf32>
    %139 = arith.addf %137, %138 : vector<8x16xf32>
    %c320 = arith.constant 320 : index
    %c0_48 = arith.constant 0 : index
    %140 = vector.load %arg1[%c320, %c0_48] : memref<552x128xf32, #tpu.memory_space<vmem>>, vector<16x64xf32>
    %cst_49 = arith.constant dense<0.000000e+00> : vector<8x64xf32>
    %141 = tpu.matmul %139, %140, %cst_49 {dimension_numbers = #tpu.dot_dimension_numbers<[1], [0], [0], [1], [0, 0, 1, 1], [], []>} : vector<8x16xf32>, vector<16x64xf32>, vector<8x64xf32> -> vector<8x64xf32>
    %c336 = arith.constant 336 : index
    %c0_50 = arith.constant 0 : index
    %142 = vector.load %arg1[%c336, %c0_50] : memref<552x128xf32, #tpu.memory_space<vmem>>, vector<1x64xf32>
    %143 = vector.broadcast %142 : vector<1x64xf32> to vector<8x64xf32>
    %144 = arith.addf %141, %143 : vector<8x64xf32>
    %c344 = arith.constant 344 : index
    %c0_51 = arith.constant 0 : index
    %145 = vector.load %arg1[%c344, %c0_51] : memref<552x128xf32, #tpu.memory_space<vmem>>, vector<1x16xf32>
    %146 = vector.extract_strided_slice %144 {offsets = [0, 0], sizes = [8, 8], strides = [1, 1]} : vector<8x64xf32> to vector<8x8xf32>
    %147 = vector.extract_strided_slice %144 {offsets = [0, 16], sizes = [8, 8], strides = [1, 1]} : vector<8x64xf32> to vector<8x8xf32>
    %148 = vector.extract_strided_slice %144 {offsets = [0, 32], sizes = [8, 16], strides = [1, 1]} : vector<8x64xf32> to vector<8x16xf32>
    %cst_52 = arith.constant dense<0.000000e+00> : vector<8x8xf32>
    %149 = tpu.matmul %146, %147, %cst_52 {dimension_numbers = #tpu.dot_dimension_numbers<[1], [1], [0], [0], [0, 0, 1, 0], [], []>} : vector<8x8xf32>, vector<8x8xf32>, vector<8x8xf32> -> vector<8x8xf32>
    %cst_53 = arith.constant 0.353553385 : f32
    %150 = vector.broadcast %cst_53 : f32 to vector<8x8xf32>
    %151 = arith.mulf %149, %150 : vector<8x8xf32>
    %152 = arith.addf %151, %29 : vector<8x8xf32>
    %153 = math.exp %152 : vector<8x8xf32>
    %cst_54 = arith.constant dense<0.000000e+00> : vector<8xf32>
    %154 = vector.multi_reduction <add>, %153, %cst_54 [1] : vector<8x8xf32> to vector<8xf32>
    %155 = vector.shape_cast %154 : vector<8xf32> to vector<8x1xf32>
    %156 = tpu.reciprocal %155 {approx = true} : vector<8x1xf32> -> vector<8x1xf32>
    %157 = vector.broadcast %156 : vector<8x1xf32> to vector<8x8xf32>
    %158 = arith.mulf %153, %157 : vector<8x8xf32>
    %cst_55 = arith.constant dense<0.000000e+00> : vector<8x16xf32>
    %159 = tpu.matmul %158, %148, %cst_55 {dimension_numbers = #tpu.dot_dimension_numbers<[1], [0], [0], [1], [0, 0, 1, 1], [], []>} : vector<8x8xf32>, vector<8x16xf32>, vector<8x16xf32> -> vector<8x16xf32>
    %160 = vector.broadcast %145 : vector<1x16xf32> to vector<8x16xf32>
    %161 = arith.addf %160, %159 : vector<8x16xf32>
    %162 = vector.extract_strided_slice %144 {offsets = [0, 8], sizes = [8, 8], strides = [1, 1]} : vector<8x64xf32> to vector<8x8xf32>
    %163 = vector.extract_strided_slice %144 {offsets = [0, 24], sizes = [8, 8], strides = [1, 1]} : vector<8x64xf32> to vector<8x8xf32>
    %164 = vector.extract_strided_slice %144 {offsets = [0, 48], sizes = [8, 16], strides = [1, 1]} : vector<8x64xf32> to vector<8x16xf32>
    %cst_56 = arith.constant dense<0.000000e+00> : vector<8x8xf32>
    %165 = tpu.matmul %162, %163, %cst_56 {dimension_numbers = #tpu.dot_dimension_numbers<[1], [1], [0], [0], [0, 0, 1, 0], [], []>} : vector<8x8xf32>, vector<8x8xf32>, vector<8x8xf32> -> vector<8x8xf32>
    %cst_57 = arith.constant 0.353553385 : f32
    %166 = vector.broadcast %cst_57 : f32 to vector<8x8xf32>
    %167 = arith.mulf %165, %166 : vector<8x8xf32>
    %168 = arith.addf %167, %29 : vector<8x8xf32>
    %169 = math.exp %168 : vector<8x8xf32>
    %cst_58 = arith.constant dense<0.000000e+00> : vector<8xf32>
    %170 = vector.multi_reduction <add>, %169, %cst_58 [1] : vector<8x8xf32> to vector<8xf32>
    %171 = vector.shape_cast %170 : vector<8xf32> to vector<8x1xf32>
    %172 = tpu.reciprocal %171 {approx = true} : vector<8x1xf32> -> vector<8x1xf32>
    %173 = vector.broadcast %172 : vector<8x1xf32> to vector<8x8xf32>
    %174 = arith.mulf %169, %173 : vector<8x8xf32>
    %cst_59 = arith.constant dense<0.000000e+00> : vector<8x16xf32>
    %175 = tpu.matmul %174, %164, %cst_59 {dimension_numbers = #tpu.dot_dimension_numbers<[1], [0], [0], [1], [0, 0, 1, 1], [], []>} : vector<8x8xf32>, vector<8x16xf32>, vector<8x16xf32> -> vector<8x16xf32>
    %176 = arith.addf %161, %175 : vector<8x16xf32>
    %177 = arith.addf %139, %176 : vector<8x16xf32>
    %c352 = arith.constant 352 : index
    %c0_60 = arith.constant 0 : index
    %178 = vector.load %arg1[%c352, %c0_60] : memref<552x128xf32, #tpu.memory_space<vmem>>, vector<1x16xf32>
    %c360 = arith.constant 360 : index
    %c0_61 = arith.constant 0 : index
    %179 = vector.load %arg1[%c360, %c0_61] : memref<552x128xf32, #tpu.memory_space<vmem>>, vector<1x16xf32>
    %cst_62 = arith.constant dense<0.000000e+00> : vector<8xf32>
    %180 = vector.multi_reduction <add>, %177, %cst_62 [1] : vector<8x16xf32> to vector<8xf32>
    %181 = vector.shape_cast %180 : vector<8xf32> to vector<8x1xf32>
    %cst_63 = arith.constant 1.600000e+01 : f32
    %182 = vector.broadcast %cst_63 : f32 to vector<8x1xf32>
    %183 = arith.divf %181, %182 : vector<8x1xf32>
    %184 = vector.broadcast %183 : vector<8x1xf32> to vector<8x16xf32>
    %185 = arith.subf %177, %184 : vector<8x16xf32>
    %186 = arith.mulf %185, %185 : vector<8x16xf32>
    %cst_64 = arith.constant dense<0.000000e+00> : vector<8xf32>
    %187 = vector.multi_reduction <add>, %186, %cst_64 [1] : vector<8x16xf32> to vector<8xf32>
    %188 = vector.shape_cast %187 : vector<8xf32> to vector<8x1xf32>
    %cst_65 = arith.constant 1.600000e+01 : f32
    %189 = vector.broadcast %cst_65 : f32 to vector<8x1xf32>
    %190 = arith.divf %188, %189 : vector<8x1xf32>
    %191 = vector.broadcast %183 : vector<8x1xf32> to vector<8x16xf32>
    %192 = arith.subf %177, %191 : vector<8x16xf32>
    %cst_66 = arith.constant 9.99999996E-13 : f32
    %193 = vector.broadcast %cst_66 : f32 to vector<8x1xf32>
    %194 = arith.addf %190, %193 : vector<8x1xf32>
    %195 = math.rsqrt %194 : vector<8x1xf32>
    %196 = vector.broadcast %195 : vector<8x1xf32> to vector<8x16xf32>
    %197 = arith.mulf %192, %196 : vector<8x16xf32>
    %198 = vector.broadcast %178 : vector<1x16xf32> to vector<8x16xf32>
    %199 = arith.mulf %197, %198 : vector<8x16xf32>
    %200 = vector.broadcast %179 : vector<1x16xf32> to vector<8x16xf32>
    %201 = arith.addf %199, %200 : vector<8x16xf32>
    %c368 = arith.constant 368 : index
    %c0_67 = arith.constant 0 : index
    %202 = vector.load %arg1[%c368, %c0_67] : memref<552x128xf32, #tpu.memory_space<vmem>>, vector<16x64xf32>
    %cst_68 = arith.constant dense<0.000000e+00> : vector<8x64xf32>
    %203 = tpu.matmul %201, %202, %cst_68 {dimension_numbers = #tpu.dot_dimension_numbers<[1], [0], [0], [1], [0, 0, 1, 1], [], []>} : vector<8x16xf32>, vector<16x64xf32>, vector<8x64xf32> -> vector<8x64xf32>
    %c384 = arith.constant 384 : index
    %c0_69 = arith.constant 0 : index
    %204 = vector.load %arg1[%c384, %c0_69] : memref<552x128xf32, #tpu.memory_space<vmem>>, vector<1x64xf32>
    %205 = vector.broadcast %204 : vector<1x64xf32> to vector<8x64xf32>
    %206 = arith.addf %203, %205 : vector<8x64xf32>
    %cst_70 = arith.constant 5.000000e-01 : f32
    %207 = vector.broadcast %cst_70 : f32 to vector<8x64xf32>
    %208 = arith.mulf %207, %206 : vector<8x64xf32>
    %cst_71 = arith.constant 4.471500e-02 : f32
    %209 = vector.broadcast %cst_71 : f32 to vector<8x64xf32>
    %210 = arith.mulf %209, %206 : vector<8x64xf32>
    %211 = arith.mulf %210, %206 : vector<8x64xf32>
    %212 = arith.mulf %211, %206 : vector<8x64xf32>
    %213 = arith.addf %206, %212 : vector<8x64xf32>
    %cst_72 = arith.constant 0.797884583 : f32
    %214 = vector.broadcast %cst_72 : f32 to vector<8x64xf32>
    %215 = arith.mulf %214, %213 : vector<8x64xf32>
    %216 = math.tanh %215 : vector<8x64xf32>
    %cst_73 = arith.constant 1.000000e+00 : f32
    %217 = vector.broadcast %cst_73 : f32 to vector<8x64xf32>
    %218 = arith.addf %217, %216 : vector<8x64xf32>
    %219 = arith.mulf %208, %218 : vector<8x64xf32>
    %c392 = arith.constant 392 : index
    %c0_74 = arith.constant 0 : index
    %220 = vector.load %arg1[%c392, %c0_74] : memref<552x128xf32, #tpu.memory_space<vmem>>, vector<64x16xf32>
    %cst_75 = arith.constant dense<0.000000e+00> : vector<8x16xf32>
    %221 = tpu.matmul %219, %220, %cst_75 {dimension_numbers = #tpu.dot_dimension_numbers<[1], [0], [0], [1], [0, 0, 1, 1], [], []>} : vector<8x64xf32>, vector<64x16xf32>, vector<8x16xf32> -> vector<8x16xf32>
    %c456 = arith.constant 456 : index
    %c0_76 = arith.constant 0 : index
    %222 = vector.load %arg1[%c456, %c0_76] : memref<552x128xf32, #tpu.memory_space<vmem>>, vector<1x16xf32>
    %223 = vector.broadcast %222 : vector<1x16xf32> to vector<8x16xf32>
    %224 = arith.addf %221, %223 : vector<8x16xf32>
    %225 = arith.addf %201, %224 : vector<8x16xf32>
    %c464 = arith.constant 464 : index
    %c0_77 = arith.constant 0 : index
    %226 = vector.load %arg1[%c464, %c0_77] : memref<552x128xf32, #tpu.memory_space<vmem>>, vector<1x16xf32>
    %c472 = arith.constant 472 : index
    %c0_78 = arith.constant 0 : index
    %227 = vector.load %arg1[%c472, %c0_78] : memref<552x128xf32, #tpu.memory_space<vmem>>, vector<1x16xf32>
    %cst_79 = arith.constant dense<0.000000e+00> : vector<8xf32>
    %228 = vector.multi_reduction <add>, %225, %cst_79 [1] : vector<8x16xf32> to vector<8xf32>
    %229 = vector.shape_cast %228 : vector<8xf32> to vector<8x1xf32>
    %cst_80 = arith.constant 1.600000e+01 : f32
    %230 = vector.broadcast %cst_80 : f32 to vector<8x1xf32>
    %231 = arith.divf %229, %230 : vector<8x1xf32>
    %232 = vector.broadcast %231 : vector<8x1xf32> to vector<8x16xf32>
    %233 = arith.subf %225, %232 : vector<8x16xf32>
    %234 = arith.mulf %233, %233 : vector<8x16xf32>
    %cst_81 = arith.constant dense<0.000000e+00> : vector<8xf32>
    %235 = vector.multi_reduction <add>, %234, %cst_81 [1] : vector<8x16xf32> to vector<8xf32>
    %236 = vector.shape_cast %235 : vector<8xf32> to vector<8x1xf32>
    %cst_82 = arith.constant 1.600000e+01 : f32
    %237 = vector.broadcast %cst_82 : f32 to vector<8x1xf32>
    %238 = arith.divf %236, %237 : vector<8x1xf32>
    %239 = vector.broadcast %231 : vector<8x1xf32> to vector<8x16xf32>
    %240 = arith.subf %225, %239 : vector<8x16xf32>
    %cst_83 = arith.constant 9.99999996E-13 : f32
    %241 = vector.broadcast %cst_83 : f32 to vector<8x1xf32>
    %242 = arith.addf %238, %241 : vector<8x1xf32>
    %243 = math.rsqrt %242 : vector<8x1xf32>
    %244 = vector.broadcast %243 : vector<8x1xf32> to vector<8x16xf32>
    %245 = arith.mulf %240, %244 : vector<8x16xf32>
    %246 = vector.broadcast %226 : vector<1x16xf32> to vector<8x16xf32>
    %247 = arith.mulf %245, %246 : vector<8x16xf32>
    %248 = vector.broadcast %227 : vector<1x16xf32> to vector<8x16xf32>
    %249 = arith.addf %247, %248 : vector<8x16xf32>
    %c480 = arith.constant 480 : index
    %c0_84 = arith.constant 0 : index
    %250 = vector.load %arg1[%c480, %c0_84] : memref<552x128xf32, #tpu.memory_space<vmem>>, vector<16x32xf32>
    %cst_85 = arith.constant dense<0.000000e+00> : vector<8x32xf32>
    %251 = tpu.matmul %249, %250, %cst_85 {dimension_numbers = #tpu.dot_dimension_numbers<[1], [0], [0], [1], [0, 0, 1, 1], [], []>} : vector<8x16xf32>, vector<16x32xf32>, vector<8x32xf32> -> vector<8x32xf32>
    %c504 = arith.constant 504 : index
    %c0_86 = arith.constant 0 : index
    %252 = vector.load %arg1[%c504, %c0_86] : memref<552x128xf32, #tpu.memory_space<vmem>>, vector<1x32xf32>
    %253 = vector.broadcast %252 : vector<1x32xf32> to vector<8x32xf32>
    %254 = arith.addf %251, %253 : vector<8x32xf32>
    %c496 = arith.constant 496 : index
    %c0_87 = arith.constant 0 : index
    %255 = vector.load %arg1[%c496, %c0_87] : memref<552x128xf32, #tpu.memory_space<vmem>>, vector<8x32xf32>
    %c512 = arith.constant 512 : index
    %c0_88 = arith.constant 0 : index
    %256 = vector.load %arg1[%c512, %c0_88] : memref<552x128xf32, #tpu.memory_space<vmem>>, vector<32x32xf32>
    %cst_89 = arith.constant 0.000000e+00 : f32
    %257 = vector.broadcast %cst_89 : f32 to vector<2x8xf32>
    %cst_90 = arith.constant 0.000000e+00 : f32
    %258 = vector.broadcast %cst_90 : f32 to vector<2x8xf32>
    %cst_91 = arith.constant 0.000000e+00 : f32
    %259 = vector.broadcast %cst_91 : f32 to vector<2x32xf32>
    %260 = vector.extract_strided_slice %254 {offsets = [0, 0], sizes = [2, 32], strides = [1, 1]} : vector<8x32xf32> to vector<2x32xf32>
    %cst_92 = arith.constant dense<0.000000e+00> : vector<2x32xf32>
    %261 = tpu.matmul %257, %255, %cst_92 {dimension_numbers = #tpu.dot_dimension_numbers<[1], [0], [0], [1], [0, 0, 1, 1], [], []>} : vector<2x8xf32>, vector<8x32xf32>, vector<2x32xf32> -> vector<2x32xf32>
    %262 = arith.addf %260, %261 : vector<2x32xf32>
    %263 = vector.extract_strided_slice %262 {offsets = [0, 0], sizes = [2, 8], strides = [1, 1]} : vector<2x32xf32> to vector<2x8xf32>
    %264 = arith.negf %263 : vector<2x8xf32>
    %265 = math.exp %264 : vector<2x8xf32>
    %cst_93 = arith.constant 1.000000e+00 : f32
    %266 = vector.broadcast %cst_93 : f32 to vector<2x8xf32>
    %267 = arith.addf %266, %265 : vector<2x8xf32>
    %268 = arith.divf %266, %267 : vector<2x8xf32>
    %269 = vector.extract_strided_slice %262 {offsets = [0, 8], sizes = [2, 8], strides = [1, 1]} : vector<2x32xf32> to vector<2x8xf32>
    %270 = arith.negf %269 : vector<2x8xf32>
    %271 = math.exp %270 : vector<2x8xf32>
    %cst_94 = arith.constant 1.000000e+00 : f32
    %272 = vector.broadcast %cst_94 : f32 to vector<2x8xf32>
    %273 = arith.addf %272, %271 : vector<2x8xf32>
    %274 = arith.divf %272, %273 : vector<2x8xf32>
    %275 = vector.extract_strided_slice %262 {offsets = [0, 16], sizes = [2, 8], strides = [1, 1]} : vector<2x32xf32> to vector<2x8xf32>
    %276 = math.tanh %275 : vector<2x8xf32>
    %277 = vector.extract_strided_slice %262 {offsets = [0, 24], sizes = [2, 8], strides = [1, 1]} : vector<2x32xf32> to vector<2x8xf32>
    %278 = arith.negf %277 : vector<2x8xf32>
    %279 = math.exp %278 : vector<2x8xf32>
    %cst_95 = arith.constant 1.000000e+00 : f32
    %280 = vector.broadcast %cst_95 : f32 to vector<2x8xf32>
    %281 = arith.addf %280, %279 : vector<2x8xf32>
    %282 = arith.divf %280, %281 : vector<2x8xf32>
    %283 = arith.mulf %274, %258 : vector<2x8xf32>
    %284 = arith.mulf %268, %276 : vector<2x8xf32>
    %285 = arith.addf %283, %284 : vector<2x8xf32>
    %286 = math.tanh %285 : vector<2x8xf32>
    %287 = arith.mulf %282, %286 : vector<2x8xf32>
    %288 = vector.extract_strided_slice %256 {offsets = [0, 0], sizes = [8, 32], strides = [1, 1]} : vector<32x32xf32> to vector<8x32xf32>
    %cst_96 = arith.constant dense<0.000000e+00> : vector<2x32xf32>
    %289 = tpu.matmul %287, %288, %cst_96 {dimension_numbers = #tpu.dot_dimension_numbers<[1], [0], [0], [1], [0, 0, 1, 1], [], []>} : vector<2x8xf32>, vector<8x32xf32>, vector<2x32xf32> -> vector<2x32xf32>
    %290 = arith.addf %259, %289 : vector<2x32xf32>
    %291 = vector.extract_strided_slice %254 {offsets = [2, 0], sizes = [2, 32], strides = [1, 1]} : vector<8x32xf32> to vector<2x32xf32>
    %cst_97 = arith.constant dense<0.000000e+00> : vector<2x32xf32>
    %292 = tpu.matmul %287, %255, %cst_97 {dimension_numbers = #tpu.dot_dimension_numbers<[1], [0], [0], [1], [0, 0, 1, 1], [], []>} : vector<2x8xf32>, vector<8x32xf32>, vector<2x32xf32> -> vector<2x32xf32>
    %293 = arith.addf %291, %292 : vector<2x32xf32>
    %294 = vector.extract_strided_slice %293 {offsets = [0, 0], sizes = [2, 8], strides = [1, 1]} : vector<2x32xf32> to vector<2x8xf32>
    %295 = arith.negf %294 : vector<2x8xf32>
    %296 = math.exp %295 : vector<2x8xf32>
    %cst_98 = arith.constant 1.000000e+00 : f32
    %297 = vector.broadcast %cst_98 : f32 to vector<2x8xf32>
    %298 = arith.addf %297, %296 : vector<2x8xf32>
    %299 = arith.divf %297, %298 : vector<2x8xf32>
    %300 = vector.extract_strided_slice %293 {offsets = [0, 8], sizes = [2, 8], strides = [1, 1]} : vector<2x32xf32> to vector<2x8xf32>
    %301 = arith.negf %300 : vector<2x8xf32>
    %302 = math.exp %301 : vector<2x8xf32>
    %cst_99 = arith.constant 1.000000e+00 : f32
    %303 = vector.broadcast %cst_99 : f32 to vector<2x8xf32>
    %304 = arith.addf %303, %302 : vector<2x8xf32>
    %305 = arith.divf %303, %304 : vector<2x8xf32>
    %306 = vector.extract_strided_slice %293 {offsets = [0, 16], sizes = [2, 8], strides = [1, 1]} : vector<2x32xf32> to vector<2x8xf32>
    %307 = math.tanh %306 : vector<2x8xf32>
    %308 = vector.extract_strided_slice %293 {offsets = [0, 24], sizes = [2, 8], strides = [1, 1]} : vector<2x32xf32> to vector<2x8xf32>
    %309 = arith.negf %308 : vector<2x8xf32>
    %310 = math.exp %309 : vector<2x8xf32>
    %cst_100 = arith.constant 1.000000e+00 : f32
    %311 = vector.broadcast %cst_100 : f32 to vector<2x8xf32>
    %312 = arith.addf %311, %310 : vector<2x8xf32>
    %313 = arith.divf %311, %312 : vector<2x8xf32>
    %314 = arith.mulf %305, %285 : vector<2x8xf32>
    %315 = arith.mulf %299, %307 : vector<2x8xf32>
    %316 = arith.addf %314, %315 : vector<2x8xf32>
    %317 = math.tanh %316 : vector<2x8xf32>
    %318 = arith.mulf %313, %317 : vector<2x8xf32>
    %319 = vector.extract_strided_slice %256 {offsets = [8, 0], sizes = [8, 32], strides = [1, 1]} : vector<32x32xf32> to vector<8x32xf32>
    %cst_101 = arith.constant dense<0.000000e+00> : vector<2x32xf32>
    %320 = tpu.matmul %318, %319, %cst_101 {dimension_numbers = #tpu.dot_dimension_numbers<[1], [0], [0], [1], [0, 0, 1, 1], [], []>} : vector<2x8xf32>, vector<8x32xf32>, vector<2x32xf32> -> vector<2x32xf32>
    %321 = arith.addf %290, %320 : vector<2x32xf32>
    %322 = vector.extract_strided_slice %254 {offsets = [4, 0], sizes = [2, 32], strides = [1, 1]} : vector<8x32xf32> to vector<2x32xf32>
    %cst_102 = arith.constant dense<0.000000e+00> : vector<2x32xf32>
    %323 = tpu.matmul %318, %255, %cst_102 {dimension_numbers = #tpu.dot_dimension_numbers<[1], [0], [0], [1], [0, 0, 1, 1], [], []>} : vector<2x8xf32>, vector<8x32xf32>, vector<2x32xf32> -> vector<2x32xf32>
    %324 = arith.addf %322, %323 : vector<2x32xf32>
    %325 = vector.extract_strided_slice %324 {offsets = [0, 0], sizes = [2, 8], strides = [1, 1]} : vector<2x32xf32> to vector<2x8xf32>
    %326 = arith.negf %325 : vector<2x8xf32>
    %327 = math.exp %326 : vector<2x8xf32>
    %cst_103 = arith.constant 1.000000e+00 : f32
    %328 = vector.broadcast %cst_103 : f32 to vector<2x8xf32>
    %329 = arith.addf %328, %327 : vector<2x8xf32>
    %330 = arith.divf %328, %329 : vector<2x8xf32>
    %331 = vector.extract_strided_slice %324 {offsets = [0, 8], sizes = [2, 8], strides = [1, 1]} : vector<2x32xf32> to vector<2x8xf32>
    %332 = arith.negf %331 : vector<2x8xf32>
    %333 = math.exp %332 : vector<2x8xf32>
    %cst_104 = arith.constant 1.000000e+00 : f32
    %334 = vector.broadcast %cst_104 : f32 to vector<2x8xf32>
    %335 = arith.addf %334, %333 : vector<2x8xf32>
    %336 = arith.divf %334, %335 : vector<2x8xf32>
    %337 = vector.extract_strided_slice %324 {offsets = [0, 16], sizes = [2, 8], strides = [1, 1]} : vector<2x32xf32> to vector<2x8xf32>
    %338 = math.tanh %337 : vector<2x8xf32>
    %339 = vector.extract_strided_slice %324 {offsets = [0, 24], sizes = [2, 8], strides = [1, 1]} : vector<2x32xf32> to vector<2x8xf32>
    %340 = arith.negf %339 : vector<2x8xf32>
    %341 = math.exp %340 : vector<2x8xf32>
    %cst_105 = arith.constant 1.000000e+00 : f32
    %342 = vector.broadcast %cst_105 : f32 to vector<2x8xf32>
    %343 = arith.addf %342, %341 : vector<2x8xf32>
    %344 = arith.divf %342, %343 : vector<2x8xf32>
    %345 = arith.mulf %336, %316 : vector<2x8xf32>
    %346 = arith.mulf %330, %338 : vector<2x8xf32>
    %347 = arith.addf %345, %346 : vector<2x8xf32>
    %348 = math.tanh %347 : vector<2x8xf32>
    %349 = arith.mulf %344, %348 : vector<2x8xf32>
    %350 = vector.extract_strided_slice %256 {offsets = [16, 0], sizes = [8, 32], strides = [1, 1]} : vector<32x32xf32> to vector<8x32xf32>
    %cst_106 = arith.constant dense<0.000000e+00> : vector<2x32xf32>
    %351 = tpu.matmul %349, %350, %cst_106 {dimension_numbers = #tpu.dot_dimension_numbers<[1], [0], [0], [1], [0, 0, 1, 1], [], []>} : vector<2x8xf32>, vector<8x32xf32>, vector<2x32xf32> -> vector<2x32xf32>
    %352 = arith.addf %321, %351 : vector<2x32xf32>
    %353 = vector.extract_strided_slice %254 {offsets = [6, 0], sizes = [2, 32], strides = [1, 1]} : vector<8x32xf32> to vector<2x32xf32>
    %cst_107 = arith.constant dense<0.000000e+00> : vector<2x32xf32>
    %354 = tpu.matmul %349, %255, %cst_107 {dimension_numbers = #tpu.dot_dimension_numbers<[1], [0], [0], [1], [0, 0, 1, 1], [], []>} : vector<2x8xf32>, vector<8x32xf32>, vector<2x32xf32> -> vector<2x32xf32>
    %355 = arith.addf %353, %354 : vector<2x32xf32>
    %356 = vector.extract_strided_slice %355 {offsets = [0, 0], sizes = [2, 8], strides = [1, 1]} : vector<2x32xf32> to vector<2x8xf32>
    %357 = arith.negf %356 : vector<2x8xf32>
    %358 = math.exp %357 : vector<2x8xf32>
    %cst_108 = arith.constant 1.000000e+00 : f32
    %359 = vector.broadcast %cst_108 : f32 to vector<2x8xf32>
    %360 = arith.addf %359, %358 : vector<2x8xf32>
    %361 = arith.divf %359, %360 : vector<2x8xf32>
    %362 = vector.extract_strided_slice %355 {offsets = [0, 8], sizes = [2, 8], strides = [1, 1]} : vector<2x32xf32> to vector<2x8xf32>
    %363 = arith.negf %362 : vector<2x8xf32>
    %364 = math.exp %363 : vector<2x8xf32>
    %cst_109 = arith.constant 1.000000e+00 : f32
    %365 = vector.broadcast %cst_109 : f32 to vector<2x8xf32>
    %366 = arith.addf %365, %364 : vector<2x8xf32>
    %367 = arith.divf %365, %366 : vector<2x8xf32>
    %368 = vector.extract_strided_slice %355 {offsets = [0, 16], sizes = [2, 8], strides = [1, 1]} : vector<2x32xf32> to vector<2x8xf32>
    %369 = math.tanh %368 : vector<2x8xf32>
    %370 = vector.extract_strided_slice %355 {offsets = [0, 24], sizes = [2, 8], strides = [1, 1]} : vector<2x32xf32> to vector<2x8xf32>
    %371 = arith.negf %370 : vector<2x8xf32>
    %372 = math.exp %371 : vector<2x8xf32>
    %cst_110 = arith.constant 1.000000e+00 : f32
    %373 = vector.broadcast %cst_110 : f32 to vector<2x8xf32>
    %374 = arith.addf %373, %372 : vector<2x8xf32>
    %375 = arith.divf %373, %374 : vector<2x8xf32>
    %376 = arith.mulf %367, %347 : vector<2x8xf32>
    %377 = arith.mulf %361, %369 : vector<2x8xf32>
    %378 = arith.addf %376, %377 : vector<2x8xf32>
    %379 = math.tanh %378 : vector<2x8xf32>
    %380 = arith.mulf %375, %379 : vector<2x8xf32>
    %381 = vector.extract_strided_slice %256 {offsets = [24, 0], sizes = [8, 32], strides = [1, 1]} : vector<32x32xf32> to vector<8x32xf32>
    %cst_111 = arith.constant dense<0.000000e+00> : vector<2x32xf32>
    %382 = tpu.matmul %380, %381, %cst_111 {dimension_numbers = #tpu.dot_dimension_numbers<[1], [0], [0], [1], [0, 0, 1, 1], [], []>} : vector<2x8xf32>, vector<8x32xf32>, vector<2x32xf32> -> vector<2x32xf32>
    %383 = arith.addf %352, %382 : vector<2x32xf32>
    %c544 = arith.constant 544 : index
    %c0_112 = arith.constant 0 : index
    %384 = vector.load %arg1[%c544, %c0_112] : memref<552x128xf32, #tpu.memory_space<vmem>>, vector<1x32xf32>
    %385 = vector.broadcast %384 : vector<1x32xf32> to vector<2x32xf32>
    %386 = arith.addf %383, %385 : vector<2x32xf32>
    %c0_113 = arith.constant 0 : index
    %c0_114 = arith.constant 0 : index
    %387 = vector.load %arg2[%c0_113, %c0_114] : memref<2x32xf32, #tpu.memory_space<vmem>>, vector<2x32xf32>
    tpu.vector_store %arg2[%c0_113, %c0_114], %386 {strides = array<i32>} : memref<2x32xf32, #tpu.memory_space<vmem>>, vector<2x32xf32>,
    return
  }
}

</mosaic_0001>

<bundles_post_ra>
// kernel: _lambda_.1
= control target key start
LH: loop header
LB: loop body
LE: loop exit
PB: predicated region body
PF: predicated region fallthrough
CT: control target
= control target key end

     0   :  { %7 = vsyncpa [#allocation3], 0  ;;  %s2913_s0 = inlined_call_operand.vmem [shape: f32[8,128], index: 0, kind: input, shape index: {}]   ;;  %s2914_s1 = inlined_call_operand.hbm [shape: f32[552,128], index: 1, kind: input, shape index: {}]   ;;  %s2915_s2 = inlined_call_operand.hbm [shape: f32[2,32], index: 2, kind: output, shape index: {}]  }
   0x1   :  { %8 = vsyncpa [#allocation4], 0  ;;  %s2674_s9 = smov [#allocation2]  }
   0x2   :  { %s16_s10 = sshll.u32 %s2674_s9, 4  ;;  %s17_s10 = int_to_ptr.vmem [resolvable:$true] %s16_s10 }
   0x3   :  { %s2638_s11 = scalar_lea.vmem %s17_s10, 8832  ;;  %p2643_p1 = scmp.lt.s32.totalorder %s17_s10, %s17_s10 }
   0x4   :  { %p2639_p0 = scmp.ne.s32.totalorder %s17_s10, %s2638_s11  ;;  %p2644_p2 = scmp.lt.s32.totalorder %s2638_s11, %s2638_s11 }
   0x6   :  { %p2645_p3 = por %p2644_p2, %p2643_p1 }
   0x8   :  { %p2646_p4 = pnand %p2645_p3, %p2639_p0 }
   0xa   :  { %2649 = shalt.err (!%p2646_p4)
}
   0xb   :  { %s2675_s12 = smov 128   ;;  %s2676_s13 = smov 8  }
   0xc   :  { %22 = dma.hbm_to_vmem [thread:$0]  %s2914_s1, 8832, %s17_s10, [#allocation3], %s2675_s12, %s2675_s12, %s2676_s13  }
   0xd   :  { %2670 = dma.done.wait [#allocation3], 8832  }
   0xe   :  { %2671 = vsyncadd [#allocation3], 4294958464  ;;  %v2677_v0 = vmov 0.0   ;;  %vm2678_vm0 = vmmov 0   ;;  %v42_v1 = vld [vmem:[#allocation2 + $0x78] sm:$0xff]  ;;  %v41_v2 = vld [vmem:[#allocation2 + $0x70] sm:$0xff] }
   0xf   :  { %2368 = vmatprep.subr.mxu0 %v2677_v0  ;;  %2400 = vmatprep.mubr.msk.f32.mxu0 %vm2678_vm0, %v2677_v0  ;;  %v40_v3 = vld [vmem:[#allocation2 + $0x68] sm:$0xff]  ;;  %v39_v4 = vld [vmem:[#allocation2 + $0x60] sm:$0xff]  ;;  %v38_v5 = vld [vmem:[#allocation2 + $0x58] sm:$0xff]  ;;  %vm116_vm1 = vcmask 130048   ;;  %s2680_s17 = smov 112   ;;  %s2681_s18 = smov 104  }
  0x10   :  { %2403 = vmatprep.subr.mxu1 %v2677_v0  ;;  %2407 = vmatprep.mubr.msk.f32.mxu1 %vm2678_vm0, %v2677_v0  ;;  %v37_v6 = vld [vmem:[#allocation2 + $0x50] sm:$0xff]  ;;  %v36_v7 = vld [vmem:[#allocation2 + $0x48] sm:$0xff]  ;;  %v35_v8 = vld [vmem:[#allocation2 + $0x40] sm:$0xff]  ;;  %s2682_s19 = smov 120   ;;  %vm226_vm2 = vcmask 64512   ;;  %s2683_s20 = smov 80  }
  0x11   :  { %2369 = vmatpush3.msra.mxu0 %v42_v1  ;;  %v34_v9 = vld [vmem:[#allocation2 + $0x38] sm:$0xff]  ;;  %v33_v10 = vld [vmem:[#allocation2 + $0x30] sm:$0xff]  ;;  %v32_v11 = vld [vmem:[#allocation2 + $0x28] sm:$0xff]  ;;  %vm683_vm3 = vcmask 523264   ;;  %s2684_s21 = smov 16   ;;  %s2685_s22 = smov [#allocation5]  }
  0x12   :  { %2370 = vmatprep.subr.mxu0 %v2677_v0  ;;  %v31_v12 = vld [vmem:[#allocation2 + $0x20] sm:$0xff]  ;;  %v30_v13 = vld [vmem:[#allocation2 + $0x18] sm:$0xff]  ;;  %v29_v14 = vld [vmem:[#allocation2 + $0x10] sm:$0xff]  ;;  %s2227_s23 = sshll.u32 %s2685_s22, 4  ;;  %vm2219_vm4 = vcmask 254976   ;;  %s2228_s23 = int_to_ptr.vmem [resolvable:$true] %s2227_s23 }
  0x13   :  { %2371 = vmatpush3.msra.mxu0 %v41_v2  ;;  %v28_v15 = vld [vmem:[#allocation2 + $0x8] sm:$0xff]  ;;  %v27_v16 = vld [vmem:[#allocation2] sm:$0xff]  ;;  %v2237_v36 = vld [vmem:[#allocation2 + $0x90] ss:$0 sm:$0xff]  ;;  %s2650_s24 = scalar_lea.vmem %s2228_s23, 32  ;;  %p2655_p6 = scmp.lt.s32.totalorder %s2228_s23, %s2228_s23 }
  0x14   :  { %2372 = vmatprep.subr.mxu0 %v2677_v0  ;;  %v26_v17 = vld [vmem:[%s2913_s0] sm:$0xff]  ;;  %v143_v28 = vld [vmem:[#allocation2 + $0xa8] sm:$0xff]  ;;  %v2238_v39 = vld [vmem:[#allocation2 + $0xb0] ss:$0 sm:$0xff]  ;;  %s2679_s0 = smov 96   ;;  %p2651_p5 = scmp.ne.s32.totalorder %s2228_s23, %s2650_s24 }
  0x15   :  { %2373 = vmatpush3.msra.mxu0 %v40_v3  ;;  %v43_v18 = vld [vmem:[#allocation2 + $0x80] sm:$0xff]  ;;  %2404 = vmatpush3.msra.mxu1 %v143_v28  ;;  %v2236_v34 = vld [vmem:[#allocation2 + $0x88] ss:$0 sm:$0xff]  ;;  %v2752_v45 = vld [vmem:[#allocation2 + $0x98] sm:$0xff]  ;;  %p2656_p7 = scmp.lt.s32.totalorder %s2650_s24, %s2650_s24 }
  0x16   :  { %2374 = vmatprep.subr.mxu0 %v2677_v0  ;;  %v142_v29 = vld [vmem:[#allocation2 + $0xa0] sm:$0xff]  ;;  %2405 = vmatprep.subr.mxu1 %v2677_v0  ;;  %v2248_v28 = vld [vmem:[#allocation2 + $0xc8] ss:$0 sm:$0xff] }
  0x17   :  { %2375 = vmatpush3.msra.mxu0 %v39_v4  ;;  %2406 = vmatpush3.msra.mxu1 %v142_v29  ;;  %p2657_p8 = por %p2656_p7, %p2655_p6 }
  0x18   :  { %2376 = vmatprep.subr.mxu0 %v2677_v0  ;;  %2410 = vmatprep.subr.mxu1 %v2677_v0 }
  0x19   :  { %2377 = vmatpush3.msra.mxu0 %v38_v5  ;;  %p2658_p9 = pnand %p2657_p8, %p2651_p5 }
  0x1a   :  { %2378 = vmatprep.subr.mxu0 %v2677_v0 }
  0x1b   :  { %2379 = vmatpush3.msra.mxu0 %v37_v6 }
  0x1c   :  { %2380 = vmatprep.subr.mxu0 %v2677_v0 }
  0x1d   :  { %2381 = vmatpush3.msra.mxu0 %v36_v7 }
  0x1e   :  { %2382 = vmatprep.subr.mxu0 %v2677_v0 }
  0x1f   :  { %2383 = vmatpush3.msra.mxu0 %v35_v8  ;;  %v2243_v8 = vld [vmem:[#allocation2 + $0xb8] ss:$0 sm:$0xff] }
  0x20   :  { %2384 = vmatprep.subr.mxu0 %v2677_v0 }
  0x21   :  { %2385 = vmatpush3.msra.mxu0 %v34_v9 }
  0x22   :  { %2386 = vmatprep.subr.mxu0 %v2677_v0 }
  0x23   :  { %2387 = vmatpush3.msra.mxu0 %v33_v10 }
  0x24   :  { %2388 = vmatprep.subr.mxu0 %v2677_v0 }
  0x25   :  { %2389 = vmatpush3.msra.mxu0 %v32_v11 }
  0x26   :  { %2390 = vmatprep.subr.mxu0 %v2677_v0 }
  0x27   :  { %2391 = vmatpush3.msra.mxu0 %v31_v12 }
  0x28   :  { %2392 = vmatprep.subr.mxu0 %v2677_v0 }
  0x29   :  { %2393 = vmatpush3.msra.mxu0 %v30_v13 }
  0x2a   :  { %2394 = vmatprep.subr.mxu0 %v2677_v0 }
  0x2b   :  { %2395 = vmatpush3.msra.mxu0 %v29_v14 }
  0x2c   :  { %2396 = vmatprep.subr.mxu0 %v2677_v0 }
  0x2d   :  { %2397 = vmatpush3.msra.mxu0 %v28_v15 }
  0x2e   :  { %2398 = vmatprep.subr.mxu0 %v2677_v0 }
  0x2f   :  { %2399 = vmatpush3.msra.mxu0 %v27_v16 }
  0x30   :  { %2401 = vmatmul.mubr.f32.vlgmr.msra.gmra.mxu0 %v26_v17  ;;  %2456 = vmatprep.subr.mxu0 %v2677_v0 }
  0x31   :  { %2460 = vmatprep.mubr.msk.f32.mxu0 %vm2678_vm0, %v2677_v0 }
  0xf0   :  { %v110_v19 = vpop.f32.mrf.mxu0 }
  0xf1   :  { %v111_v20 = vadd.f32 %v110_v19, %v43_v18 }
  0xf2   :  { %v2402_v21 = vpop.f32.mrf.mxu0 }
  0xf3   :  { %v117_v22 = vsel %vm116_vm1, %v111_v20, 0.0  ;;  %v581_v21 = vld [vmem:[#allocation2 + $0xd0] sm:$0xff] }
  0xf4   :  { %118 = vadd.xlane.f32.xlu0 %v117_v22 }
 0x17d   :  { %v119_v23 = vpop.xlane.xlu0 %118 }
 0x17e   :  { %v121_v24 = vmul.f32 0.0625, %v119_v23 }
 0x180   :  { %v122_v25 = vsub.f32 %v111_v20, %v121_v24  ;;  %v582_v20 = vld [vmem:[#allocation2 + $0xd8] sm:$0xff] }
 0x182   :  { %v123_v26 = vmul.f32 %v122_v25, %v122_v25 }
 0x184   :  { %v124_v27 = vsel %vm116_vm1, %v123_v26, 0.0  ;;  %v2247_v26 = vld [vmem:[#allocation2 + $0xc0] ss:$0 sm:$0xff] }
 0x185   :  { %125 = vadd.xlane.f32.xlu0 %v124_v27 }
 0x20e   :  { %v126_v30 = vpop.xlane.xlu0 %125 }
 0x20f   :  { %v127_v31 = vmul.f32 0.0625, %v126_v30 }
 0x211   :  { %v128_v32 = vadd.f32 1e-12, %v127_v31  ;;  %v677_v31 = vld [vmem:[#allocation2 + $0x120] sm:$0xff] }
 0x213   :  { %2568 = vrsqrt.f32 %v128_v32  ;;  %v676_v32 = vld [vmem:[#allocation2 + $0x118] sm:$0xff] }
 0x220   :  { %v2569_v33 = vpop.eup %2568 }
 0x221   :  { %v130_v35 = vmul.f32 %v2569_v33, %v122_v25  ;;  %v675_v33 = vld [vmem:[#allocation2 + $0x110] sm:$0xff] }
 0x223   :  { %v135_v37 = vmul.f32 %v2236_v34, %v130_v35  ;;  %v674_v34 = vld [vmem:[#allocation2 + $0x108] sm:$0xff]  ;;  %v673_v35 = vld [vmem:[#allocation2 + $0x100] sm:$0xff] }
 0x225   :  { %v2736_v38 = vadd.f32 %v2237_v36, %v135_v37  ;;  %v672_v36 = vld [vmem:[#allocation2 + $0xf8] sm:$0xff]  ;;  %v671_v37 = vld [vmem:[#allocation2 + $0xf0] sm:$0xff] }
 0x227   :  { %2408 = vmatmul.mubr.msk.f32.vlgmr.msra.gmra.mxu1 %vm116_vm1, %v2736_v38 }
 0x228   :  { %2412 = vmatprep.mubr.msk.f32.mxu1 %vm2678_vm0, %v2677_v0 }
 0x2e7   :  { %v218_v40 = vpop.f32.mrf.mxu1 }
 0x2e8   :  { %v219_v41 = vadd.f32 %v2238_v39, %v218_v40  ;;  %v2249_v39 = vld [vmem:[#allocation2 + $0xe0] ss:$0 sm:$0xff] }
 0x2e9   :  { %v2409_v42 = vpop.f32.mrf.mxu1 }
 0x2ea   :  { %310 = vrot.lane.b32.xlu0 %v219_v41, %s2679_s0  ;;  %224 = vrot.lane.b32.xlu1 %v219_v41, %s2680_s17 }
 0x2ee   :  { %393 = vrot.lane.b32.xlu0 %v219_v41, %s2681_s18 }
 0x2f2   :  { %391 = vrot.lane.b32.xlu0 %v219_v41, %s2682_s19 }
 0x35c   :  { %v225_v43 = vpop.permute.xlu1 %224  ;;  %v311_v44 = vpop.permute.xlu0 %310 }
 0x35d   :  { %2411 = vmatpush3.xpose.msk.msra.mxu1 %vm226_vm2, %v225_v43 }
 0x35e   :  { %2415 = vmatprep.subr.mxu1 %v2677_v0 }
 0x360   :  { %2413 = vmatmul.mubr.msk.f32.vlgmr.msra.gmra.mxu1 %vm226_vm2, %v219_v41  ;;  %v394_v55 = vpop.permute.xlu0 %393 }
 0x361   :  { %2416 = vmatpush3.msra.mxu1 %v311_v44  ;;  %2417 = vmatprep.mubr.msk.f32.mxu1 %vm2678_vm0, %v2677_v0 }
 0x362   :  { %2420 = vmatprep.subr.mxu1 %v2677_v0 }
 0x364   :  { %v392_v57 = vpop.permute.xlu0 %391 }
 0x420   :  { %v297_v46 = vpop.f32.mrf.mxu1 }
 0x421   :  { %v301_v47 = vmul.f32 0.35355338, %v297_v46 }
 0x422   :  { %v2414_v48 = vpop.f32.mrf.mxu1 }
 0x423   :  { %v302_v49 = vadd.f32 %v301_v47, %v2752_v45 }
 0x425   :  { %v303_v50 = vmul.f32 1.442695, %v302_v49 }
 0x427   :  { %2570 = vpow2.f32 %v303_v50 }
 0x434   :  { %v2571_v51 = vpop.eup %2570 }
 0x435   :  { %v305_v52 = vsel %vm226_vm2, %v2571_v51, 0.0 }
 0x436   :  { %306 = vadd.xlane.f32.xlu1 %v305_v52 }
 0x447   :  { %478 = vrot.lane.b32.xlu1 %v219_v41, %s2683_s20 }
 0x4bf   :  { %v307_v53 = vpop.xlane.xlu1 %306 }
 0x4c0   :  { %2572 = vrcp.f32 %v307_v53  ;;  %v2251_v53 = vld [vmem:[#allocation2 + $0x128] ss:$0 sm:$0xff] }
 0x4c3   :  { %v479_v58 = vpop.permute.xlu1 %478 }
 0x4cd   :  { %v2573_v54 = vpop.eup %2572 }
 0x4ce   :  { %v309_v56 = vmul.f32 %v2573_v54, %v2571_v51 }
 0x4d0   :  { %2418 = vmatmul.mubr.msk.f32.vlgmr.msra.gmra.mxu1 %vm226_vm2, %v309_v56 }
 0x4d1   :  { %2421 = vmatpush3.xpose.msk.msra.mxu1 %vm226_vm2, %v394_v55  ;;  %2422 = vmatprep.mubr.msk.f32.mxu1 %vm2678_vm0, %v2677_v0 }
 0x4d2   :  { %2425 = vmatprep.subr.mxu1 %v2677_v0 }
 0x4d4   :  { %2423 = vmatmul.mubr.msk.f32.vlgmr.msra.gmra.mxu1 %vm226_vm2, %v392_v57 }
 0x4d5   :  { %2426 = vmatpush3.msra.mxu1 %v479_v58  ;;  %2427 = vmatprep.mubr.msk.f32.mxu1 %vm2678_vm0, %v2677_v0 }
 0x4d6   :  { %2430 = vmatprep.subr.mxu1 %v2677_v0 }
 0x590   :  { %v382_v59 = vpop.f32.mrf.mxu1 }
 0x591   :  { %v390_v9 = vadd.f32 %v2243_v8, %v382_v59 }
 0x592   :  { %v2419_v60 = vpop.f32.mrf.mxu1 }
 0x594   :  { %v465_v61 = vpop.f32.mrf.mxu1 }
 0x595   :  { %v469_v62 = vmul.f32 0.35355338, %v465_v61 }
 0x596   :  { %v2424_v63 = vpop.f32.mrf.mxu1 }
 0x597   :  { %v470_v1 = vadd.f32 %v469_v62, %v2752_v45 }
 0x599   :  { %v471_v2 = vmul.f32 1.442695, %v470_v1  ;;  %v784_v1 = vld [vmem:[#allocation2 + $0x148] sm:$0xff] }
 0x59a   :  { %2457 = vmatpush3.msra.mxu0 %v784_v1 }
 0x59b   :  { %2574 = vpow2.f32 %v471_v2  ;;  %v783_v2 = vld [vmem:[#allocation2 + $0x140] sm:$0xff]  ;;  %2458 = vmatprep.subr.mxu0 %v2677_v0 }
 0x59c   :  { %2459 = vmatpush3.msra.mxu0 %v783_v2 }
 0x59d   :  { %2463 = vmatprep.subr.mxu0 %v2677_v0 }
 0x5a8   :  { %v2575_v3 = vpop.eup %2574 }
 0x5a9   :  { %v473_v4 = vsel %vm226_vm2, %v2575_v3, 0.0 }
 0x5aa   :  { %474 = vadd.xlane.f32.xlu0 %v473_v4 }
 0x633   :  { %v475_v5 = vpop.xlane.xlu0 %474 }
 0x634   :  { %2576 = vrcp.f32 %v475_v5 }
 0x641   :  { %v2577_v6 = vpop.eup %2576 }
 0x642   :  { %v477_v7 = vmul.f32 %v2577_v6, %v2575_v3 }
 0x644   :  { %2428 = vmatmul.mubr.msk.f32.vlgmr.msra.gmra.mxu1 %vm226_vm2, %v477_v7  ;;  %v2253_v7 = vld [vmem:[#allocation2 + $0x130] ss:$0 sm:$0xff] }
 0x645   :  { %2434 = vmatprep.mubr.msk.f32.mxu1 %vm2678_vm0, %v2677_v0  ;;  %2431 = vmatpush3.msra.mxu1 %v582_v20 }
 0x646   :  { %2432 = vmatprep.subr.mxu1 %v2677_v0 }
 0x647   :  { %2433 = vmatpush3.msra.mxu1 %v581_v21 }
 0x648   :  { %2437 = vmatprep.subr.mxu1 %v2677_v0 }
 0x704   :  { %v550_v10 = vpop.f32.mrf.mxu1 }
 0x705   :  { %v554_v11 = vadd.f32 %v550_v10, %v390_v9  ;;  %v2254_v9 = vld [vmem:[#allocation2 + $0x138] ss:$0 sm:$0xff] }
 0x706   :  { %v2429_v12 = vpop.f32.mrf.mxu1 }
 0x707   :  { %v555_v13 = vadd.f32 %v554_v11, %v2736_v38  ;;  %v670_v38 = vld [vmem:[#allocation2 + $0xe8] sm:$0xff]  ;;  %v2255_v12 = vld [vmem:[#allocation2 + $0x150] ss:$0 sm:$0xff] }
 0x709   :  { %v558_v14 = vsel %vm116_vm1, %v555_v13, 0.0 }
 0x70a   :  { %559 = vadd.xlane.f32.xlu1 %v558_v14 }
 0x793   :  { %v560_v15 = vpop.xlane.xlu1 %559 }
 0x794   :  { %v561_v16 = vmul.f32 0.0625, %v560_v15 }
 0x796   :  { %v562_v17 = vsub.f32 %v555_v13, %v561_v16 }
 0x798   :  { %v563_v18 = vmul.f32 %v562_v17, %v562_v17 }
 0x79a   :  { %v564_v19 = vsel %vm116_vm1, %v563_v18, 0.0 }
 0x79b   :  { %565 = vadd.xlane.f32.xlu0 %v564_v19 }
 0x824   :  { %v566_v22 = vpop.xlane.xlu0 %565 }
 0x825   :  { %v567_v23 = vmul.f32 0.0625, %v566_v22 }
 0x827   :  { %v568_v24 = vadd.f32 1e-12, %v567_v23 }
 0x829   :  { %2578 = vrsqrt.f32 %v568_v24 }
 0x836   :  { %v2579_v25 = vpop.eup %2578 }
 0x837   :  { %v570_v27 = vmul.f32 %v2579_v25, %v562_v17 }
 0x839   :  { %v575_v29 = vmul.f32 %v2247_v26, %v570_v27 }
 0x83b   :  { %v580_v30 = vadd.f32 %v2248_v28, %v575_v29 }
 0x83d   :  { %2435 = vmatmul.mubr.msk.f32.vlgmr.msra.gmra.mxu1 %vm116_vm1, %v580_v30 }
 0x83e   :  { %2453 = vmatprep.mubr.msk.f32.mxu1 %vm2678_vm0, %v2677_v0  ;;  %2438 = vmatpush3.msra.mxu1 %v677_v31 }
 0x83f   :  { %2439 = vmatprep.subr.mxu1 %v2677_v0 }
 0x840   :  { %2440 = vmatpush3.msra.mxu1 %v676_v32 }
 0x841   :  { %2441 = vmatprep.subr.mxu1 %v2677_v0 }
 0x842   :  { %2442 = vmatpush3.msra.mxu1 %v675_v33 }
 0x843   :  { %2443 = vmatprep.subr.mxu1 %v2677_v0 }
 0x844   :  { %2444 = vmatpush3.msra.mxu1 %v674_v34 }
 0x845   :  { %2445 = vmatprep.subr.mxu1 %v2677_v0 }
 0x846   :  { %2446 = vmatpush3.msra.mxu1 %v673_v35 }
 0x847   :  { %2447 = vmatprep.subr.mxu1 %v2677_v0 }
 0x848   :  { %2448 = vmatpush3.msra.mxu1 %v672_v36 }
 0x849   :  { %2449 = vmatprep.subr.mxu1 %v2677_v0 }
 0x84a   :  { %2450 = vmatpush3.msra.mxu1 %v671_v37 }
 0x84b   :  { %2451 = vmatprep.subr.mxu1 %v2677_v0 }
 0x84c   :  { %2452 = vmatpush3.msra.mxu1 %v670_v38 }
 0x84d   :  { %2473 = vmatprep.subr.mxu1 %v2677_v0 }
 0x8fd   :  { %v657_v40 = vpop.f32.mrf.mxu1 }
 0x8fe   :  { %v658_v41 = vadd.f32 %v2249_v39, %v657_v40  ;;  %v2260_v40 = vld [vmem:[#allocation2 + $0x158] ss:$0 sm:$0xff] }
 0x8ff   :  { %v2436_v42 = vpop.f32.mrf.mxu1 }
 0x900   :  { %v662_v43 = vmul.f32 0.044715, %v658_v41  ;;  %v661_v50 = vmul.f32 0.5, %v658_v41 }
 0x902   :  { %v663_v44 = vmul.f32 %v662_v43, %v658_v41 }
 0x904   :  { %v664_v46 = vmul.f32 %v663_v44, %v658_v41 }
 0x906   :  { %v665_v47 = vadd.f32 %v664_v46, %v658_v41 }
 0x908   :  { %v666_v48 = vmul.f32 0.7978846, %v665_v47 }
 0x90a   :  { %2580 = vtanh.f32 %v666_v48 }
 0x917   :  { %v2581_v49 = vpop.eup %2580 }
 0x918   :  { %v668_v51 = vadd.f32 1.0, %v2581_v49 }
 0x91a   :  { %v669_v52 = vmul.f32 %v668_v51, %v661_v50 }
 0x91c   :  { %2454 = vmatmul.mubr.msk.f32.vlgmr.msra.gmra.mxu1 %vm683_vm3, %v669_v52 }
 0x91d   :  { %2475 = vmatprep.mubr.msk.f32.mxu1 %vm2678_vm0, %v2677_v0 }
 0x9dc   :  { %v753_v54 = vpop.f32.mrf.mxu1 }
 0x9dd   :  { %v754_v55 = vadd.f32 %v2251_v53, %v753_v54 }
 0x9de   :  { %v2455_v56 = vpop.f32.mrf.mxu1 }
 0x9df   :  { %v757_v57 = vadd.f32 %v754_v55, %v580_v30  ;;  %v1222_v55 = vld [vmem:[#allocation2 + $0x178] sm:$0xff]  ;;  %v1221_v56 = vld [vmem:[#allocation2 + $0x170] sm:$0xff] }
 0x9e1   :  { %v760_v58 = vsel %vm116_vm1, %v757_v57, 0.0 }
 0x9e2   :  { %761 = vadd.xlane.f32.xlu0 %v760_v58 }
 0xa6b   :  { %v762_v59 = vpop.xlane.xlu0 %761 }
 0xa6c   :  { %v763_v60 = vmul.f32 0.0625, %v762_v59 }
 0xa6e   :  { %v764_v61 = vsub.f32 %v757_v57, %v763_v60 }
 0xa70   :  { %v765_v62 = vmul.f32 %v764_v61, %v764_v61 }
 0xa72   :  { %v766_v63 = vsel %vm116_vm1, %v765_v62, 0.0 }
 0xa73   :  { %767 = vadd.xlane.f32.xlu0 %v766_v63  ;;  %v2265_v63 = vld [vmem:[#allocation2 + $0x168] ss:$0 sm:$0xff] }
 0xafc   :  { %v768_v3 = vpop.xlane.xlu0 %767 }
 0xafd   :  { %v769_v4 = vmul.f32 0.0625, %v768_v3  ;;  %v1317_v3 = vld [vmem:[#allocation2 + $0x1c0] sm:$0xff] }
 0xaff   :  { %v770_v5 = vadd.f32 1e-12, %v769_v4  ;;  %v1316_v4 = vld [vmem:[#allocation2 + $0x1b8] sm:$0xff] }
 0xb01   :  { %2582 = vrsqrt.f32 %v770_v5  ;;  %v1315_v5 = vld [vmem:[#allocation2 + $0x1b0] sm:$0xff] }
 0xb0e   :  { %v2583_v6 = vpop.eup %2582 }
 0xb0f   :  { %v772_v8 = vmul.f32 %v2583_v6, %v764_v61  ;;  %v2264_v61 = vld [vmem:[#allocation2 + $0x160] ss:$0 sm:$0xff]  ;;  %v1314_v6 = vld [vmem:[#allocation2 + $0x1a8] sm:$0xff] }
 0xb11   :  { %v777_v10 = vmul.f32 %v2253_v7, %v772_v8  ;;  %v1313_v7 = vld [vmem:[#allocation2 + $0x1a0] sm:$0xff]  ;;  %v1312_v8 = vld [vmem:[#allocation2 + $0x198] sm:$0xff] }
 0xb13   :  { %v2794_v11 = vadd.f32 %v2254_v9, %v777_v10  ;;  %v1311_v9 = vld [vmem:[#allocation2 + $0x190] sm:$0xff]  ;;  %v1310_v10 = vld [vmem:[#allocation2 + $0x188] sm:$0xff] }
 0xb15   :  { %2461 = vmatmul.mubr.msk.f32.vlgmr.msra.gmra.mxu0 %vm116_vm1, %v2794_v11 }
 0xb16   :  { %2465 = vmatprep.mubr.msk.f32.mxu0 %vm2678_vm0, %v2677_v0 }
 0xbd5   :  { %v859_v13 = vpop.f32.mrf.mxu0 }
 0xbd6   :  { %v860_v14 = vadd.f32 %v2255_v12, %v859_v13 }
 0xbd7   :  { %v2462_v15 = vpop.f32.mrf.mxu0 }
 0xbd8   :  { %1033 = vrot.lane.b32.xlu1 %v860_v14, %s2681_s18  ;;  %865 = vrot.lane.b32.xlu0 %v860_v14, %s2680_s17 }
 0xbdc   :  { %1031 = vrot.lane.b32.xlu0 %v860_v14, %s2682_s19 }
 0xc4a   :  { %v1034_v16 = vpop.permute.xlu1 %1033  ;;  %v866_v17 = vpop.permute.xlu0 %865 }
 0xc4b   :  { %2464 = vmatpush3.xpose.msk.msra.mxu0 %vm226_vm2, %v866_v17  ;;  %2474 = vmatpush3.xpose.msk.msra.mxu1 %vm226_vm2, %v1034_v16 }
 0xc4c   :  { %2468 = vmatprep.subr.mxu0 %v2677_v0  ;;  %2483 = vmatprep.subr.mxu1 %v2677_v0 }
 0xc4e   :  { %2466 = vmatmul.mubr.msk.f32.vlgmr.msra.gmra.mxu0 %vm226_vm2, %v860_v14  ;;  %v1032_v18 = vpop.permute.xlu0 %1031 }
 0xc4f   :  { %2476 = vmatmul.mubr.msk.f32.vlgmr.msra.gmra.mxu1 %vm226_vm2, %v1032_v18  ;;  %2470 = vmatprep.mubr.msk.f32.mxu0 %vm2678_vm0, %v2677_v0 }
 0xc50   :  { %2487 = vmatprep.mubr.msk.f32.mxu1 %vm2678_vm0, %v2677_v0  ;;  %2484 = vmatpush3.msra.mxu1 %v1222_v55 }
 0xc51   :  { %2485 = vmatprep.subr.mxu1 %v2677_v0 }
 0xc52   :  { %2486 = vmatpush3.msra.mxu1 %v1221_v56 }
 0xc53   :  { %2509 = vmatprep.subr.mxu1 %v2677_v0 }
 0xd0e   :  { %v937_v19 = vpop.f32.mrf.mxu0 }
 0xd0f   :  { %v941_v20 = vmul.f32 0.35355338, %v937_v19  ;;  %v1105_v21 = vpop.f32.mrf.mxu1 }
 0xd10   :  { %v1109_v22 = vmul.f32 0.35355338, %v1105_v21  ;;  %v2467_v23 = vpop.f32.mrf.mxu0 }
 0xd11   :  { %v942_v24 = vadd.f32 %v941_v20, %v2752_v45  ;;  %v2477_v25 = vpop.f32.mrf.mxu1 }
 0xd12   :  { %v1110_v26 = vadd.f32 %v1109_v22, %v2752_v45 }
 0xd13   :  { %v943_v27 = vmul.f32 1.442695, %v942_v24  ;;  %v2268_v24 = vld [vmem:[#allocation2 + $0x1c8] ss:$0 sm:$0xff] }
 0xd14   :  { %v1111_v28 = vmul.f32 1.442695, %v1110_v26 }
 0xd15   :  { %2584 = vpow2.f32 %v943_v27 }
 0xd16   :  { %2586 = vpow2.f32 %v1111_v28 }
 0xd22   :  { %v2585_v29 = vpop.eup %2584 }
 0xd23   :  { %v2587_v30 = vpop.eup %2586  ;;  %v945_v31 = vsel %vm226_vm2, %v2585_v29, 0.0 }
 0xd24   :  { %946 = vadd.xlane.f32.xlu0 %v945_v31  ;;  %v1113_v32 = vsel %vm226_vm2, %v2587_v30, 0.0 }
 0xd25   :  { %1114 = vadd.xlane.f32.xlu1 %v1113_v32 }
 0xd36   :  { %1118 = vrot.lane.b32.xlu1 %v860_v14, %s2683_s20 }
 0xd3a   :  { %950 = vrot.lane.b32.xlu0 %v860_v14, %s2679_s0 }
 0xdad   :  { %v947_v33 = vpop.xlane.xlu0 %946 }
 0xdae   :  { %2588 = vrcp.f32 %v947_v33  ;;  %v1115_v34 = vpop.xlane.xlu1 %1114 }
 0xdaf   :  { %2590 = vrcp.f32 %v1115_v34 }
 0xdb1   :  { %v951_v45 = vpop.permute.xlu0 %950 }
 0xdb2   :  { %2469 = vmatpush3.msra.mxu0 %v951_v45  ;;  %v1119_v38 = vpop.permute.xlu1 %1118  ;;  %v1423_v45 = vld [vmem:[#allocation2 + $0x1e8] sm:$0xff] }
 0xdb3   :  { %2478 = vmatprep.subr.mxu0 %v2677_v0 }
 0xdbb   :  { %v2589_v35 = vpop.eup %2588 }
 0xdbc   :  { %v949_v36 = vmul.f32 %v2589_v35, %v2585_v29  ;;  %v2591_v37 = vpop.eup %2590  ;;  %v1422_v35 = vld [vmem:[#allocation2 + $0x1e0] sm:$0xff] }
 0xdbd   :  { %v1117_v39 = vmul.f32 %v2591_v37, %v2587_v30 }
 0xdbe   :  { %2471 = vmatmul.mubr.msk.f32.vlgmr.msra.gmra.mxu0 %vm226_vm2, %v949_v36 }
 0xdbf   :  { %2479 = vmatpush3.msra.mxu0 %v1119_v38  ;;  %2480 = vmatprep.mubr.msk.f32.mxu0 %vm2678_vm0, %v2677_v0 }
 0xdc0   :  { %2490 = vmatprep.subr.mxu0 %v2677_v0 }
 0xdc2   :  { %2481 = vmatmul.mubr.msk.f32.vlgmr.msra.gmra.mxu0 %vm226_vm2, %v1117_v39 }
 0xdc3   :  { %2506 = vmatprep.mubr.msk.f32.mxu0 %vm2678_vm0, %v2677_v0  ;;  %2491 = vmatpush3.msra.mxu0 %v1317_v3 }
 0xdc4   :  { %2492 = vmatprep.subr.mxu0 %v2677_v0 }
 0xdc5   :  { %2493 = vmatpush3.msra.mxu0 %v1316_v4 }
 0xdc6   :  { %2494 = vmatprep.subr.mxu0 %v2677_v0 }
 0xdc7   :  { %2495 = vmatpush3.msra.mxu0 %v1315_v5 }
 0xdc8   :  { %2496 = vmatprep.subr.mxu0 %v2677_v0 }
 0xdc9   :  { %2497 = vmatpush3.msra.mxu0 %v1314_v6 }
 0xdca   :  { %2498 = vmatprep.subr.mxu0 %v2677_v0 }
 0xdcb   :  { %2499 = vmatpush3.msra.mxu0 %v1313_v7 }
 0xdcc   :  { %2500 = vmatprep.subr.mxu0 %v2677_v0 }
 0xdcd   :  { %2501 = vmatpush3.msra.mxu0 %v1312_v8 }
 0xdce   :  { %2502 = vmatprep.subr.mxu0 %v2677_v0 }
 0xdcf   :  { %2503 = vmatpush3.msra.mxu0 %v1311_v9 }
 0xdd0   :  { %2504 = vmatprep.subr.mxu0 %v2677_v0 }
 0xdd1   :  { %2505 = vmatpush3.msra.mxu0 %v1310_v10 }
 0xdd2   :  { %2531 = vmatprep.subr.mxu0 %v2677_v0 }
 0xe7e   :  { %v1022_v41 = vpop.f32.mrf.mxu0 }
 0xe7f   :  { %v1030_v43 = vadd.f32 %v2260_v40, %v1022_v41  ;;  %v2270_v40 = vld [vmem:[#allocation2 + $0x1d0] ss:$0 sm:$0xff] }
 0xe80   :  { %v2472_v42 = vpop.f32.mrf.mxu0 }
 0xe81   :  { %v2271_v42 = vld [vmem:[#allocation2 + $0x1d8] ss:$0 sm:$0xff] }
 0xe82   :  { %v1190_v44 = vpop.f32.mrf.mxu0 }
 0xe83   :  { %v1194_v46 = vadd.f32 %v1190_v44, %v1030_v43 }
 0xe84   :  { %v2482_v47 = vpop.f32.mrf.mxu0 }
 0xe85   :  { %v1195_v48 = vadd.f32 %v1194_v46, %v2794_v11  ;;  %v2266_v11 = vld [vmem:[#allocation2 + $0x180] ss:$0 sm:$0xff]  ;;  %v2850_v46 = vld [vmem:[#allocation2 + $0x1f0] sm:$0xff]  ;;  %v2272_v47 = vld [vmem:[#allocation2 + $0x1f8] ss:$0 sm:$0xff] }
 0xe87   :  { %v1198_v49 = vsel %vm116_vm1, %v1195_v48, 0.0 }
 0xe88   :  { %1199 = vadd.xlane.f32.xlu0 %v1198_v49 }
 0xf11   :  { %v1200_v50 = vpop.xlane.xlu0 %1199 }
 0xf12   :  { %v1201_v51 = vmul.f32 0.0625, %v1200_v50 }
 0xf14   :  { %v1202_v52 = vsub.f32 %v1195_v48, %v1201_v51 }
 0xf16   :  { %v1203_v53 = vmul.f32 %v1202_v52, %v1202_v52 }
 0xf18   :  { %v1204_v54 = vsel %vm116_vm1, %v1203_v53, 0.0 }
 0xf19   :  { %1205 = vadd.xlane.f32.xlu1 %v1204_v54 }
 0xfa2   :  { %v1206_v57 = vpop.xlane.xlu1 %1205 }
 0xfa3   :  { %v1207_v58 = vmul.f32 0.0625, %v1206_v57 }
 0xfa5   :  { %v1208_v59 = vadd.f32 1e-12, %v1207_v58 }
 0xfa7   :  { %2592 = vrsqrt.f32 %v1208_v59 }
 0xfb4   :  { %v2593_v60 = vpop.eup %2592 }
 0xfb5   :  { %v1210_v62 = vmul.f32 %v2593_v60, %v1202_v52 }
 0xfb7   :  { %v1215_v1 = vmul.f32 %v2264_v61, %v1210_v62 }
 0xfb9   :  { %v1220_v2 = vadd.f32 %v2265_v63, %v1215_v1  ;;  %v1503_v1 = vld [vmem:[#allocation2 + $0x200] sm:$0xff] }
 0xfbb   :  { %2488 = vmatmul.mubr.msk.f32.vlgmr.msra.gmra.mxu1 %vm116_vm1, %v1220_v2 }
 0xfbc   :  { %2513 = vmatprep.mubr.msk.f32.mxu1 %vm2678_vm0, %v2677_v0  ;;  %2510 = vmatpush3.msra.mxu1 %v1423_v45 }
 0xfbd   :  { %2511 = vmatprep.subr.mxu1 %v2677_v0 }
 0xfbe   :  { %2512 = vmatpush3.msra.mxu1 %v1422_v35 }
 0xfbf   :  { %2516 = vmatprep.subr.mxu1 %v2677_v0 }
0x107b   :  { %v1297_v12 = vpop.f32.mrf.mxu1 }
0x107c   :  { %v1298_v13 = vadd.f32 %v2266_v11, %v1297_v12 }
0x107d   :  { %v2489_v14 = vpop.f32.mrf.mxu1 }
0x107e   :  { %v1302_v15 = vmul.f32 0.044715, %v1298_v13  ;;  %v1301_v21 = vmul.f32 0.5, %v1298_v13 }
0x1080   :  { %v1303_v16 = vmul.f32 %v1302_v15, %v1298_v13 }
0x1082   :  { %v1304_v17 = vmul.f32 %v1303_v16, %v1298_v13 }
0x1084   :  { %v1305_v18 = vadd.f32 %v1304_v17, %v1298_v13 }
0x1086   :  { %v1306_v19 = vmul.f32 0.7978846, %v1305_v18 }
0x1088   :  { %2594 = vtanh.f32 %v1306_v19 }
0x1095   :  { %v2595_v20 = vpop.eup %2594 }
0x1096   :  { %v1308_v22 = vadd.f32 1.0, %v2595_v20 }
0x1098   :  { %v1309_v23 = vmul.f32 %v1308_v22, %v1301_v21 }
0x109a   :  { %2507 = vmatmul.mubr.msk.f32.vlgmr.msra.gmra.mxu0 %vm683_vm3, %v1309_v23  ;;  %v1504_v23 = vld [vmem:[#allocation2 + $0x208] sm:$0xff] }
0x109b   :  { %2533 = vmatprep.mubr.msk.f32.mxu0 %vm2678_vm0, %v2677_v0  ;;  %2532 = vmatpush3.msra.mxu0 %v1503_v1 }
0x109c   :  { %2541 = vmatprep.subr.mxu0 %v2677_v0 }
0x115a   :  { %v1392_v25 = vpop.f32.mrf.mxu0 }
0x115b   :  { %v1393_v26 = vadd.f32 %v2268_v24, %v1392_v25 }
0x115c   :  { %v2508_v27 = vpop.f32.mrf.mxu0 }
0x115d   :  { %v1396_v28 = vadd.f32 %v1393_v26, %v1220_v2 }
0x115f   :  { %v1399_v29 = vsel %vm116_vm1, %v1396_v28, 0.0 }
0x1160   :  { %1400 = vadd.xlane.f32.xlu0 %v1399_v29 }
0x11e9   :  { %v1401_v30 = vpop.xlane.xlu0 %1400 }
0x11ea   :  { %v1402_v31 = vmul.f32 0.0625, %v1401_v30 }
0x11ec   :  { %v1403_v32 = vsub.f32 %v1396_v28, %v1402_v31 }
0x11ee   :  { %v1404_v33 = vmul.f32 %v1403_v32, %v1403_v32 }
0x11f0   :  { %v1405_v34 = vsel %vm116_vm1, %v1404_v33, 0.0 }
0x11f1   :  { %1406 = vadd.xlane.f32.xlu0 %v1405_v34 }
0x127a   :  { %v1407_v36 = vpop.xlane.xlu0 %1406 }
0x127b   :  { %v1408_v37 = vmul.f32 0.0625, %v1407_v36 }
0x127d   :  { %v1409_v38 = vadd.f32 1e-12, %v1408_v37 }
0x127f   :  { %2596 = vrsqrt.f32 %v1409_v38 }
0x128c   :  { %v2597_v39 = vpop.eup %2596 }
0x128d   :  { %v1411_v41 = vmul.f32 %v2597_v39, %v1403_v32 }
0x128f   :  { %v1416_v43 = vmul.f32 %v2270_v40, %v1411_v41 }
0x1291   :  { %v1421_v44 = vadd.f32 %v2271_v42, %v1416_v43 }
0x1293   :  { %2514 = vmatmul.mubr.msk.f32.vlgmr.msra.gmra.mxu1 %vm116_vm1, %v1421_v44 }
0x1294   :  { %2517 = vmatpush3.msra.mxu1 %v2850_v46  ;;  %2518 = vmatprep.mubr.msk.f32.mxu1 %vm2678_vm0, %v2677_v0 }
0x1295   :  { %2521 = vmatprep.subr.mxu1 %v2677_v0 }
0x1297   :  { %2519 = vmatmul.mubr.f32.vlgmr.msra.gmra.mxu1 %v2677_v0 }
0x1298   :  { %2522 = vmatpush3.msra.mxu1 %v2850_v46  ;;  %2523 = vmatprep.mubr.msk.f32.mxu1 %vm2678_vm0, %v2677_v0 }
0x1299   :  { %2526 = vmatprep.subr.mxu1 %v2677_v0 }
0x1353   :  { %v1498_v48 = vpop.f32.mrf.mxu1 }
0x1354   :  { %v2862_v50 = vadd.f32 %v2272_v47, %v1498_v48 }
0x1355   :  { %v2515_v49 = vpop.f32.mrf.mxu1 }
0x1357   :  { %v1576_v51 = vpop.f32.mrf.mxu1 }
0x1358   :  { %v1580_v52 = vadd.f32 %v1576_v51, %v2862_v50 }
0x1359   :  { %v2520_v53 = vpop.f32.mrf.mxu1 }
0x135a   :  { %2598 = vtanh.f32 %v1580_v52  ;;  %v2274_v55 = vmul.f32 -1.442695, %v1580_v52 }
0x135c   :  { %2600 = vpow2.f32 %v2274_v55 }
0x1367   :  { %v2599_v54 = vpop.eup %2598 }
0x1368   :  { %1590 = vrot.lane.b32.xlu0 %v2599_v54, %s2680_s17 }
0x1369   :  { %v2601_v56 = vpop.eup %2600 }
0x136a   :  { %v1584_v57 = vadd.f32 1.0, %v2601_v56 }
0x136c   :  { %2602 = vrcp.f32 %v1584_v57 }
0x1379   :  { %v2603_v58 = vpop.eup %2602 }
0x137a   :  { %v1588_v61 = vmul.f32 0.0, %v2603_v58 }
0x13da   :  { %v1591_v59 = vpop.permute.xlu0 %1590 }
0x13db   :  { %v1593_v60 = vmul.f32 %v2603_v58, %v1591_v59 }
0x13dd   :  { %1595 = vrot.lane.b32.xlu1 %v1593_v60, %s2676_s13 }
0x144f   :  { %v1596_v62 = vpop.permute.xlu1 %1595 }
0x1450   :  { %v1598_v63 = vadd.f32 %v1596_v62, %v1588_v61 }
0x1452   :  { %2604 = vtanh.f32 %v1598_v63  ;;  %v1692_v19 = vrot.slane %v1598_v63, 6 }
0x145f   :  { %v2605_v2 = vpop.eup %2604 }
0x1460   :  { %1601 = vrot.lane.b32.xlu1 %v2605_v2, %s2684_s21 }
0x14d2   :  { %v1602_v3 = vpop.permute.xlu1 %1601 }
0x14d3   :  { %v1604_v4 = vmul.f32 %v2603_v58, %v1602_v3 }
0x14d5   :  { %1606 = vrot.lane.b32.xlu1 %v1604_v4, %s2681_s18 }
0x1547   :  { %v1607_v5 = vpop.permute.xlu1 %1606 }
0x1548   :  { %2524 = vmatmul.mubr.msk.f32.vlgmr.msra.gmra.mxu1 %vm226_vm2, %v1607_v5  ;;  %2534 = vmatmul.mubr.msk.f32.vlgmr.msra.gmra.mxu0 %vm226_vm2, %v1607_v5 }
0x1549   :  { %2528 = vmatprep.mubr.msk.f32.mxu1 %vm2678_vm0, %v2677_v0  ;;  %2543 = vmatprep.mubr.msk.f32.mxu0 %vm2678_vm0, %v2677_v0 }
0x154a   :  { %2527 = vmatpush3.msra.mxu1 %v1504_v23 }
0x154b   :  { %2536 = vmatprep.subr.mxu1 %v2677_v0 }
0x1608   :  { %v1676_v6 = vpop.f32.mrf.mxu1  ;;  %v2876_v7 = vpop.f32.mrf.mxu0 }
0x1609   :  { %v1681_v8 = vrot.slane %v1676_v6, 6 }
0x160a   :  { %v2525_v9 = vpop.f32.mrf.mxu1  ;;  %v2535_v10 = vpop.f32.mrf.mxu0 }
0x160b   :  { %v1683_v11 = vadd.f32 %v1681_v8, %v2862_v50 }
0x160d   :  { %2606 = vtanh.f32 %v1683_v11  ;;  %v2276_v13 = vmul.f32 -1.442695, %v1683_v11 }
0x160f   :  { %2608 = vpow2.f32 %v2276_v13 }
0x161a   :  { %v2607_v12 = vpop.eup %2606 }
0x161b   :  { %1696 = vrot.lane.b32.xlu0 %v2607_v12, %s2680_s17 }
0x161c   :  { %v2609_v14 = vpop.eup %2608 }
0x161d   :  { %v1687_v15 = vadd.f32 1.0, %v2609_v14  ;;  %v2285_v14 = vld [vmem:[#allocation2 + $0x220] ss:$0 sm:$0xff] }
0x161f   :  { %2610 = vrcp.f32 %v1687_v15 }
0x162c   :  { %v2611_v16 = vpop.eup %2610 }
0x162d   :  { %v1694_v20 = vmul.f32 %v2611_v16, %v1692_v19 }
0x168d   :  { %v1697_v17 = vpop.permute.xlu0 %1696 }
0x168e   :  { %v1699_v18 = vmul.f32 %v2611_v16, %v1697_v17 }
0x1690   :  { %1701 = vrot.lane.b32.xlu1 %v1699_v18, %s2676_s13 }
0x1702   :  { %v1702_v21 = vpop.permute.xlu1 %1701 }
0x1703   :  { %v1704_v22 = vadd.f32 %v1702_v21, %v1694_v20 }
0x1705   :  { %2612 = vtanh.f32 %v1704_v22  ;;  %v1939_v41 = vrot.slane %v1704_v22, 6 }
0x1712   :  { %v2613_v24 = vpop.eup %2612 }
0x1713   :  { %1707 = vrot.lane.b32.xlu0 %v2613_v24, %s2684_s21 }
0x1785   :  { %v1708_v25 = vpop.permute.xlu0 %1707 }
0x1786   :  { %v1710_v26 = vmul.f32 %v2611_v16, %v1708_v25 }
0x1788   :  { %v1712_v27 = vrot.slane %v1710_v26, 2 }
0x178a   :  { %1713 = vrot.lane.b32.xlu1 %v1712_v27, %s2681_s18 }
0x17fc   :  { %v1714_v28 = vpop.permute.xlu1 %1713 }
0x17fd   :  { %2529 = vmatmul.mubr.msk.f32.vlgmr.msra.gmra.mxu1 %vm226_vm2, %v1714_v28 }
0x17fe   :  { %2537 = vmatpush3.msra.mxu1 %v2850_v46  ;;  %2538 = vmatprep.mubr.msk.f32.mxu1 %vm2678_vm0, %v2677_v0 }
0x17ff   :  { %2546 = vmatprep.subr.mxu1 %v2677_v0 }
0x1801   :  { %2539 = vmatmul.mubr.msk.f32.vlgmr.msra.gmra.mxu1 %vm226_vm2, %v1714_v28 }
0x1802   :  { %2547 = vmatpush3.msra.mxu1 %v2850_v46  ;;  %2548 = vmatprep.mubr.msk.f32.mxu1 %vm2678_vm0, %v2677_v0  ;;  %v1505_v46 = vld [vmem:[#allocation2 + $0x210] sm:$0xff] }
0x1803   :  { %2542 = vmatpush3.msra.mxu0 %v1505_v46 }
0x1804   :  { %2551 = vmatprep.subr.mxu0 %v2677_v0 }
0x18bd   :  { %v1783_v29 = vpop.f32.mrf.mxu1 }
0x18be   :  { %v1854_v53 = vadd.f32 %v2876_v7, %v1783_v29 }
0x18bf   :  { %v2530_v30 = vpop.f32.mrf.mxu1 }
0x18c1   :  { %v1923_v31 = vpop.f32.mrf.mxu1 }
0x18c2   :  { %v1928_v32 = vrot.slane %v1923_v31, 4 }
0x18c3   :  { %v2540_v33 = vpop.f32.mrf.mxu1 }
0x18c4   :  { %v1930_v34 = vadd.f32 %v1928_v32, %v2862_v50 }
0x18c6   :  { %2614 = vtanh.f32 %v1930_v34  ;;  %v2280_v35 = vmul.f32 -1.442695, %v1930_v34 }
0x18c8   :  { %2616 = vpow2.f32 %v2280_v35 }
0x18d3   :  { %v2615_v45 = vpop.eup %2614 }
0x18d4   :  { %1943 = vrot.lane.b32.xlu0 %v2615_v45, %s2680_s17 }
0x18d5   :  { %v2617_v36 = vpop.eup %2616 }
0x18d6   :  { %v1934_v37 = vadd.f32 1.0, %v2617_v36 }
0x18d8   :  { %2618 = vrcp.f32 %v1934_v37 }
0x18e5   :  { %v2619_v38 = vpop.eup %2618 }
0x18e6   :  { %v1941_v42 = vmul.f32 %v2619_v38, %v1939_v41 }
0x1946   :  { %v1944_v39 = vpop.permute.xlu0 %1943 }
0x1947   :  { %v1946_v40 = vmul.f32 %v2619_v38, %v1944_v39 }
0x1949   :  { %1948 = vrot.lane.b32.xlu1 %v1946_v40, %s2676_s13 }
0x19bb   :  { %v1949_v43 = vpop.permute.xlu1 %1948 }
0x19bc   :  { %v1951_v44 = vadd.f32 %v1949_v43, %v1941_v42 }
0x19be   :  { %2620 = vtanh.f32 %v1951_v44  ;;  %v2117_v4 = vrot.slane %v1951_v44, 6 }
0x19cb   :  { %v2621_v47 = vpop.eup %2620 }
0x19cc   :  { %1954 = vrot.lane.b32.xlu0 %v2621_v47, %s2684_s21 }
0x1a3e   :  { %v1955_v48 = vpop.permute.xlu0 %1954 }
0x1a3f   :  { %v1957_v49 = vmul.f32 %v2619_v38, %v1955_v48 }
0x1a41   :  { %v1959_v51 = vrot.slane %v1957_v49, 4 }
0x1a43   :  { %1960 = vrot.lane.b32.xlu1 %v1959_v51, %s2681_s18 }
0x1ab5   :  { %v1961_v52 = vpop.permute.xlu1 %1960 }
0x1ab6   :  { %2544 = vmatmul.mubr.msk.f32.vlgmr.msra.gmra.mxu0 %vm226_vm2, %v1961_v52  ;;  %2549 = vmatmul.mubr.msk.f32.vlgmr.msra.gmra.mxu1 %vm226_vm2, %v1961_v52 }
0x1ab7   :  { %2553 = vmatprep.mubr.msk.f32.mxu0 %vm2678_vm0, %v2677_v0 }
0x1b76   :  { %v2030_v54 = vpop.f32.mrf.mxu0  ;;  %v2101_v55 = vpop.f32.mrf.mxu1 }
0x1b77   :  { %v2034_v56 = vadd.f32 %v2030_v54, %v1854_v53  ;;  %v2106_v57 = vrot.slane %v2101_v55, 2 }
0x1b78   :  { %v2545_v58 = vpop.f32.mrf.mxu0  ;;  %v2550_v59 = vpop.f32.mrf.mxu1 }
0x1b79   :  { %v2108_v60 = vadd.f32 %v2106_v57, %v2862_v50  ;;  %v1506_v50 = vld [vmem:[#allocation2 + $0x218] sm:$0xff] }
0x1b7a   :  { %2552 = vmatpush3.msra.mxu0 %v1506_v50 }
0x1b7b   :  { %2622 = vtanh.f32 %v2108_v60  ;;  %v2283_v62 = vmul.f32 -1.442695, %v2108_v60 }
0x1b7d   :  { %2624 = vpow2.f32 %v2283_v62 }
0x1b88   :  { %v2623_v61 = vpop.eup %2622 }
0x1b89   :  { %2121 = vrot.lane.b32.xlu0 %v2623_v61, %s2680_s17 }
0x1b8a   :  { %v2625_v63 = vpop.eup %2624 }
0x1b8b   :  { %v2112_v1 = vadd.f32 1.0, %v2625_v63 }
0x1b8d   :  { %2626 = vrcp.f32 %v2112_v1 }
0x1b9a   :  { %v2627_v0 = vpop.eup %2626 }
0x1b9b   :  { %v2119_v5 = vmul.f32 %v2627_v0, %v2117_v4 }
0x1bfb   :  { %v2122_v2 = vpop.permute.xlu0 %2121 }
0x1bfc   :  { %v2124_v3 = vmul.f32 %v2627_v0, %v2122_v2 }
0x1bfe   :  { %2126 = vrot.lane.b32.xlu1 %v2124_v3, %s2676_s13 }
0x1c70   :  { %v2127_v6 = vpop.permute.xlu1 %2126 }
0x1c71   :  { %v2129_v7 = vadd.f32 %v2127_v6, %v2119_v5 }
0x1c73   :  { %2628 = vtanh.f32 %v2129_v7 }
0x1c80   :  { %v2629_v8 = vpop.eup %2628 }
0x1c81   :  { %2132 = vrot.lane.b32.xlu0 %v2629_v8, %s2684_s21 }
0x1cf3   :  { %v2133_v9 = vpop.permute.xlu0 %2132 }
0x1cf4   :  { %v2135_v10 = vmul.f32 %v2627_v0, %v2133_v9 }
0x1cf6   :  { %v2137_v11 = vrot.slane %v2135_v10, 6 }
0x1cf8   :  { %2138 = vrot.lane.b32.xlu1 %v2137_v11, %s2681_s18 }
0x1d6a   :  { %v2139_v12 = vpop.permute.xlu1 %2138 }
0x1d6b   :  { %2554 = vmatmul.mubr.msk.f32.vlgmr.msra.gmra.mxu0 %vm226_vm2, %v2139_v12 }
0x1e2b   :  { %v2208_v13 = vpop.f32.mrf.mxu0 }
0x1e2c   :  { %v2212_v15 = vadd.f32 %v2208_v13, %v2034_v56 }
0x1e2d   :  { %v2555_v16 = vpop.f32.mrf.mxu0 }
0x1e2e   :  { %v2218_v17 = vadd.f32 %v2285_v14, %v2212_v15 }
0x1e30   :  { %2220 = vst.msk [vmem:[#allocation5] sm:$0x3] %vm2219_vm4, %v2218_v17 }
0x1e31   :  { %2661 = shalt.err (!%p2658_p9)
}
0x1e32   :  { %2230 = dma.vmem_to_hbm [thread:$0]  %s2228_s23, 32, %s2915_s2, [#allocation4]  }
0x1e33   :  { %2672 = dma.done.wait [#allocation4], 32  }
0x1e34   :  { %2673 = vsyncadd [#allocation4], 4294967264 }
0x1e35   :  { %2234 = vsyncpa [#allocation3], 1 }
0x1e36   :  { %2235 = vsyncpa [#allocation4], 1 }

</bundles_post_ra>
